<compile_context>
chip_gen: v7x
topology: tpu7x:2x2x1
jax: 0.10.0
libtpu: 0.0.40
codegen_flags: <defaults>
</compile_context>

<pallas_src>
import math
import numpy as np
import jax
import jax.numpy as jnp
from jax.experimental import pallas as pl
from jax.experimental.pallas import tpu as pltpu

# ---- problem sizes (small, consistent with the module) ----
B = 2          # batch
S_T = 8        # decoder (target) sequence length
S_S = 8        # encoder (source) sequence length
D_MODEL = 32
H = 4
D_K = D_MODEL // H
D_FF = 64
EPS = 1e-6
NEG_INF = -1e9

# packed bias-row layout (lane offsets into the (1, 384) slab)
_OFF_QKV1 = 0                       # [bq1|bk1|bv1]   96 lanes
_OFF_O1 = 3 * D_MODEL               # bo1             32
_OFF_Q2 = 4 * D_MODEL               # bq2             32
_OFF_KV2 = 5 * D_MODEL              # [bk2|bv2]       64
_OFF_O2 = 7 * D_MODEL               # bo2             32
_OFF_FF1 = 8 * D_MODEL              # b1              64
_OFF_FF2 = 8 * D_MODEL + D_FF       # b2              32
_BIAS_PACKED = 384                  # padded up to a multiple of 128 lanes


# ----------------------- in-kernel helpers -----------------------
def _layernorm(v, alpha, bias):
    # PyTorch reference: mean / unbiased std (correction=1) over last dim,
    # scalar alpha & bias. rsqrt goes to the EUP (free slot).
    d = v.shape[-1]
    mean = jnp.mean(v, axis=-1, keepdims=True)
    c = v - mean
    var_unbiased = jnp.sum(c * c, axis=-1, keepdims=True) * (1.0 / (d - 1))
    return alpha * c * jax.lax.rsqrt(var_unbiased + EPS) + bias


def _attend(q, k, v, score_bias, w_pack_ref, out_bias):
    """Multi-head attention core on batch-folded rows.

    q: (Rq, D_MODEL), k/v: (Rk, D_MODEL).
    score_bias: (Rq, Rk) additive mask (0 where attended, -1e9 where masked;
    also blocks cross-batch attention of the folded rows).
    w_pack_ref holds [wq|wk|wv|wo]; columns 96:128 are wo. The per-head output
    projection is accumulated, so no concat / relayout is needed.
    Note: safe only because no query row is fully masked (causal diag kept).
    """
    scale = 1.0 / math.sqrt(D_K)
    acc = None
    for h in range(H):                      # static head loop (H = 4)
        lo, hi = h * D_K, (h + 1) * D_K
        qh = q[:, lo:hi]
        kh = k[:, lo:hi]
        vh = v[:, lo:hi]
        s = jax.lax.dot_general(qh, kh, (((1,), (1,)), ((), ())),
                                preferred_element_type=jnp.float32)
        s = s * scale + score_bias
        m = jnp.max(s, axis=-1, keepdims=True)
        e = jnp.exp(s - m)
        inv_l = pl.reciprocal(jnp.sum(e, axis=-1, keepdims=True), approx=True)
        oh = jnp.dot(e, vh, preferred_element_type=jnp.float32) * inv_l
        wo_h = w_pack_ref[lo:hi, 3 * D_MODEL:4 * D_MODEL]        # (D_K, D_MODEL)
        contrib = jnp.dot(oh, wo_h, preferred_element_type=jnp.float32)
        acc = contrib if acc is None else acc + contrib
    return acc + out_bias


# ----------------------- the fused kernel -----------------------
def decoder_block_kernel(x_ref, enc_ref, sa_bias_ref, ca_bias_ref,
                         w_sa_ref, w_ca_ref, w_ff1_ref, w_ff2_ref,
                         b_ref, ln_ref, out_ref):
    x = x_ref[...]            # (B*S_T, D_MODEL)
    enc = enc_ref[...]        # (B*S_S, D_MODEL)

    # residual connection 0: pre-norm self-attention (q = k = v = norm(x))
    n0 = _layernorm(x, ln_ref[0], ln_ref[3])
    qkv = (jnp.dot(n0, w_sa_ref[:, 0:3 * D_MODEL],
                   preferred_element_type=jnp.float32)
           + b_ref[0:1, _OFF_QKV1:_OFF_QKV1 + 3 * D_MODEL])
    sa = _attend(qkv[:, 0:D_MODEL], qkv[:, D_MODEL:2 * D_MODEL],
                 qkv[:, 2 * D_MODEL:3 * D_MODEL],
                 sa_bias_ref[...], w_sa_ref,
                 b_ref[0:1, _OFF_O1:_OFF_O1 + D_MODEL])
    h1 = x + sa   # dropout == identity

    # residual connection 1: cross-attention (k, v come from raw encoder output)
    n1 = _layernorm(h1, ln_ref[1], ln_ref[4])
    q2 = (jnp.dot(n1, w_ca_ref[:, 0:D_MODEL],
                  preferred_element_type=jnp.float32)
          + b_ref[0:1, _OFF_Q2:_OFF_Q2 + D_MODEL])
    kv2 = (jnp.dot(enc, w_ca_ref[:, D_MODEL:3 * D_MODEL],
                   preferred_element_type=jnp.float32)
           + b_ref[0:1, _OFF_KV2:_OFF_KV2 + 2 * D_MODEL])
    ca = _attend(q2, kv2[:, 0:D_MODEL], kv2[:, D_MODEL:2 * D_MODEL],
                 ca_bias_ref[...], w_ca_ref,
                 b_ref[0:1, _OFF_O2:_OFF_O2 + D_MODEL])
    h2 = h1 + ca

    # residual connection 2: feed-forward
    # TODO(synk): reference code passes `lambda x: self.feed_forward_block`
    # (module object never applied -> would raise in PyTorch); we implement the
    # clearly-intended FFN residual instead.
    n2 = _layernorm(h2, ln_ref[2], ln_ref[5])
    f = (jnp.dot(n2, w_ff1_ref[...], preferred_element_type=jnp.float32)
         + b_ref[0:1, _OFF_FF1:_OFF_FF1 + D_FF])
    f = jnp.maximum(f, 0.0)
    f = (jnp.dot(f, w_ff2_ref[...], preferred_element_type=jnp.float32)
         + b_ref[0:1, _OFF_FF2:_OFF_FF2 + D_MODEL])
    out_ref[...] = h2 + f


# ----------------------- packing (done once, off the hot path) -----------------------
def pack_params(weights, ln_alpha, ln_bias):
    (wq1, bq1, wk1, bk1, wv1, bv1, wo1, bo1,
     wq2, bq2, wk2, bk2, wv2, bv2, wo2, bo2,
     w1, b1, w2, b2) = weights
    w_sa = jnp.concatenate([wq1, wk1, wv1, wo1], axis=1)     # (32, 128) lane-dense
    w_ca = jnp.concatenate([wq2, wk2, wv2, wo2], axis=1)     # (32, 128) lane-dense
    pad = _BIAS_PACKED - (8 * D_MODEL + D_FF + D_MODEL)
    b_row = jnp.concatenate(
        [bq1, bk1, bv1, bo1, bq2, bk2, bv2, bo2, b1, b2,
         jnp.zeros((1, pad), jnp.float32)], axis=1)          # (1, 384)
    ln = jnp.concatenate([ln_alpha, ln_bias,
                          jnp.zeros((2,), jnp.float32)])     # (8,) -> SMEM
    return w_sa, w_ca, w1, w2, b_row, ln


# ----------------------- wrapper -----------------------
def decoder_block(x, enc, tgt_mask, src_mask, packed):
    w_sa, w_ca, w_ff1, w_ff2, b_row, ln = packed
    b, s_t, d = x.shape
    s_s = enc.shape[1]

    # fold batch onto the sublane (row) axis: (B*S, D)
    x_flat = x.reshape(b * s_t, d)
    enc_flat = enc.reshape(b * s_s, d)

    # Convert 0/1 masks to additive biases with a block-diagonal batch structure
    # so the kernel can attend over batch-folded rows with a single add.
    tgt_keep = tgt_mask[:, 0]                                     # (B, S_T, S_T)
    src_keep = jnp.broadcast_to(src_mask[:, 0], (b, s_t, s_s))    # (B, S_T, S_S)

    def block_diag_bias(keep, rq, rk):
        full = jnp.zeros((b * rq, b * rk), keep.dtype)
        for i in range(b):                                        # static, B = 2
            full = jax.lax.dynamic_update_slice(full, keep[i], (i * rq, i * rk))
        # `mask == 0` matches torch masked_fill(mask == 0, -1e9) semantics.
        return jnp.where(full == 0, NEG_INF, 0.0).astype(jnp.float32)

    sa_bias = block_diag_bias(tgt_keep, s_t, s_t)                 # (B*S_T, B*S_T)
    ca_bias = block_diag_bias(src_keep, s_t, s_s)                 # (B*S_T, B*S_S)

    vmem = pl.BlockSpec(memory_space=pltpu.MemorySpace.VMEM)
    smem = pl.BlockSpec(memory_space=pltpu.MemorySpace.SMEM)

    out_flat = pl.pallas_call(
        decoder_block_kernel,
        out_shape=jax.ShapeDtypeStruct((b * s_t, d), jnp.float32),
        in_specs=[vmem] * 9 + [smem],      # no grid: single invocation, full blocks
        out_specs=vmem,
    )(x_flat, enc_flat, sa_bias, ca_bias, w_sa, w_ca, w_ff1, w_ff2, b_row, ln)

    return out_flat.reshape(b, s_t, d)


# ----------------------- pure-JAX reference (for checking) -----------------------
def _ref_layernorm(v, alpha, bias):
    d = v.shape[-1]
    mean = jnp.mean(v, axis=-1, keepdims=True)
    var = jnp.sum((v - mean) ** 2, axis=-1, keepdims=True) / (d - 1)
    return alpha * (v - mean) / jnp.sqrt(var + EPS) + bias


def _ref_mha(q_in, kv_in, mask, wq, bq, wk, bk, wv, bv, wo, bo):
    Bq, Sq, _ = q_in.shape
    Sk = kv_in.shape[1]
    Q = (q_in @ wq + bq).reshape(Bq, Sq, H, D_K).transpose(0, 2, 1, 3)
    K = (kv_in @ wk + bk).reshape(Bq, Sk, H, D_K).transpose(0, 2, 1, 3)
    V = (kv_in @ wv + bv).reshape(Bq, Sk, H, D_K).transpose(0, 2, 1, 3)
    scores = jnp.einsum("bhqd,bhkd->bhqk", Q, K) / math.sqrt(D_K)
    scores = jnp.where(mask == 0.0, NEG_INF, scores)
    p = jax.nn.softmax(scores, axis=-1)
    o = jnp.einsum("bhqk,bhkd->bhqd", p, V).transpose(0, 2, 1, 3).reshape(Bq, Sq, D_MODEL)
    return o @ wo + bo


def _ref_decoder(x, enc, tgt_mask, src_mask, w, ln_a, ln_b):
    (wq1, bq1, wk1, bk1, wv1, bv1, wo1, bo1,
     wq2, bq2, wk2, bk2, wv2, bv2, wo2, bo2,
     w1, b1, w2, b2) = w
    n0 = _ref_layernorm(x, ln_a[0], ln_b[0])
    h1 = x + _ref_mha(n0, n0, tgt_mask, wq1, bq1, wk1, bk1, wv1, bv1, wo1, bo1)
    n1 = _ref_layernorm(h1, ln_a[1], ln_b[1])
    h2 = h1 + _ref_mha(n1, enc, src_mask, wq2, bq2, wk2, bk2, wv2, bv2, wo2, bo2)
    n2 = _ref_layernorm(h2, ln_a[2], ln_b[2])
    f = jnp.maximum(n2 @ w1 + b1, 0.0) @ w2 + b2
    return h2 + f


# ----------------------- main -----------------------
if __name__ == "__main__":
    key = jax.random.PRNGKey(0)
    keys = jax.random.split(key, 16)

    def lin(k, fan_in, fan_out):
        kw, kb = jax.random.split(k)
        w = jax.random.normal(kw, (fan_in, fan_out), jnp.float32) * 0.05
        b = jax.random.normal(kb, (1, fan_out), jnp.float32) * 0.05
        return w, b

    # self-attention weights
    wq1, bq1 = lin(keys[0], D_MODEL, D_MODEL)
    wk1, bk1 = lin(keys[1], D_MODEL, D_MODEL)
    wv1, bv1 = lin(keys[2], D_MODEL, D_MODEL)
    wo1, bo1 = lin(keys[3], D_MODEL, D_MODEL)
    # cross-attention weights
    wq2, bq2 = lin(keys[4], D_MODEL, D_MODEL)
    wk2, bk2 = lin(keys[5], D_MODEL, D_MODEL)
    wv2, bv2 = lin(keys[6], D_MODEL, D_MODEL)
    wo2, bo2 = lin(keys[7], D_MODEL, D_MODEL)
    # feed-forward weights
    w1, b1 = lin(keys[8], D_MODEL, D_FF)
    w2, b2 = lin(keys[9], D_FF, D_MODEL)
    weights = [wq1, bq1, wk1, bk1, wv1, bv1, wo1, bo1,
               wq2, bq2, wk2, bk2, wv2, bv2, wo2, bo2,
               w1, b1, w2, b2]

    # LayerNormalization params (nn.Parameter(torch.ones(1)) / zeros(1)) for the
    # 3 ResidualConnection norms.
    ln_alpha = jnp.ones((3,), jnp.float32)
    ln_bias = jnp.zeros((3,), jnp.float32)

    packed = pack_params(weights, ln_alpha, ln_bias)

    # inputs
    x = jax.random.normal(keys[10], (B, S_T, D_MODEL), jnp.float32)
    enc = jax.random.normal(keys[11], (B, S_S, D_MODEL), jnp.float32)
    tgt_mask = jnp.broadcast_to(
        jnp.tril(jnp.ones((S_T, S_T), jnp.float32))[None, None], (B, 1, S_T, S_T)
    )
    src_mask = jnp.ones((B, 1, 1, S_S), jnp.float32)

    out = decoder_block(x, enc, tgt_mask, src_mask, packed)
    out = jax.block_until_ready(out)

    ref = _ref_decoder(x, enc, tgt_mask, src_mask, weights, ln_alpha, ln_bias)
    np.testing.assert_allclose(np.asarray(out), np.asarray(ref), rtol=1e-3, atol=1e-3)

    print("KERNEL_OK")
</pallas_src>

<mosaic_0001>
module attributes {stable_mosaic.version = 11 : i64} {
  func.func @decoder_block_kernel(%arg0: memref<16x32xf32, #tpu.memory_space<vmem>>, %arg1: memref<16x32xf32, #tpu.memory_space<vmem>>, %arg2: memref<16x16xf32, #tpu.memory_space<vmem>>, %arg3: memref<16x16xf32, #tpu.memory_space<vmem>>, %arg4: memref<32x128xf32, #tpu.memory_space<vmem>>, %arg5: memref<32x128xf32, #tpu.memory_space<vmem>>, %arg6: memref<32x64xf32, #tpu.memory_space<vmem>>, %arg7: memref<64x32xf32, #tpu.memory_space<vmem>>, %arg8: memref<1x384xf32, #tpu.memory_space<vmem>>, %arg9: memref<8xf32, #tpu.memory_space<smem>>, %arg10: memref<16x32xf32, #tpu.memory_space<vmem>>) attributes {dimension_semantics = [], scalar_prefetch = 0 : i64, scratch_operands = 0 : i64, tpu.core_type = #tpu.core_type<tc>} {
    %c0 = arith.constant 0 : index
    %c0_0 = arith.constant 0 : index
    %0 = vector.load %arg0[%c0, %c0_0] : memref<16x32xf32, #tpu.memory_space<vmem>>, vector<16x32xf32>
    %c0_1 = arith.constant 0 : index
    %c0_2 = arith.constant 0 : index
    %1 = vector.load %arg1[%c0_1, %c0_2] : memref<16x32xf32, #tpu.memory_space<vmem>>, vector<16x32xf32>
    %c0_3 = arith.constant 0 : index
    %2 = memref.load %arg9[%c0_3] : memref<8xf32, #tpu.memory_space<smem>>
    %c3 = arith.constant 3 : index
    %3 = memref.load %arg9[%c3] : memref<8xf32, #tpu.memory_space<smem>>
    %cst = arith.constant dense<0.000000e+00> : vector<16xf32>
    %4 = vector.multi_reduction <add>, %0, %cst [1] : vector<16x32xf32> to vector<16xf32>
    %5 = vector.shape_cast %4 : vector<16xf32> to vector<16x1xf32>
    %cst_4 = arith.constant 3.200000e+01 : f32
    %6 = vector.broadcast %cst_4 : f32 to vector<16x1xf32>
    %7 = arith.divf %5, %6 : vector<16x1xf32>
    %8 = vector.broadcast %7 : vector<16x1xf32> to vector<16x32xf32>
    %9 = arith.subf %0, %8 : vector<16x32xf32>
    %10 = arith.mulf %9, %9 : vector<16x32xf32>
    %cst_5 = arith.constant dense<0.000000e+00> : vector<16xf32>
    %11 = vector.multi_reduction <add>, %10, %cst_5 [1] : vector<16x32xf32> to vector<16xf32>
    %12 = vector.shape_cast %11 : vector<16xf32> to vector<16x1xf32>
    %cst_6 = arith.constant 0.0322580636 : f32
    %13 = vector.broadcast %cst_6 : f32 to vector<16x1xf32>
    %14 = arith.mulf %12, %13 : vector<16x1xf32>
    %15 = vector.broadcast %2 : f32 to vector<16x32xf32>
    %16 = arith.mulf %15, %9 : vector<16x32xf32>
    %cst_7 = arith.constant 9.99999997E-7 : f32
    %17 = vector.broadcast %cst_7 : f32 to vector<16x1xf32>
    %18 = arith.addf %14, %17 : vector<16x1xf32>
    %19 = math.rsqrt %18 : vector<16x1xf32>
    %20 = vector.broadcast %19 : vector<16x1xf32> to vector<16x32xf32>
    %21 = arith.mulf %16, %20 : vector<16x32xf32>
    %22 = vector.broadcast %3 : f32 to vector<16x32xf32>
    %23 = arith.addf %21, %22 : vector<16x32xf32>
    %c0_8 = arith.constant 0 : index
    %c0_9 = arith.constant 0 : index
    %24 = vector.load %arg4[%c0_8, %c0_9] : memref<32x128xf32, #tpu.memory_space<vmem>>, vector<32x96xf32>
    %cst_10 = arith.constant dense<0.000000e+00> : vector<16x96xf32>
    %25 = tpu.matmul %23, %24, %cst_10 {dimension_numbers = #tpu.dot_dimension_numbers<[1], [0], [0], [1], [0, 0, 1, 1], [], []>} : vector<16x32xf32>, vector<32x96xf32>, vector<16x96xf32> -> vector<16x96xf32>
    %c0_11 = arith.constant 0 : index
    %c0_12 = arith.constant 0 : index
    %26 = vector.load %arg8[%c0_11, %c0_12] : memref<1x384xf32, #tpu.memory_space<vmem>>, vector<1x96xf32>
    %27 = vector.broadcast %26 : vector<1x96xf32> to vector<16x96xf32>
    %28 = arith.addf %25, %27 : vector<16x96xf32>
    %29 = vector.extract_strided_slice %28 {offsets = [0, 0], sizes = [16, 32], strides = [1, 1]} : vector<16x96xf32> to vector<16x32xf32>
    %30 = vector.extract_strided_slice %28 {offsets = [0, 32], sizes = [16, 32], strides = [1, 1]} : vector<16x96xf32> to vector<16x32xf32>
    %31 = vector.extract_strided_slice %28 {offsets = [0, 64], sizes = [16, 32], strides = [1, 1]} : vector<16x96xf32> to vector<16x32xf32>
    %c0_13 = arith.constant 0 : index
    %c0_14 = arith.constant 0 : index
    %32 = vector.load %arg2[%c0_13, %c0_14] : memref<16x16xf32, #tpu.memory_space<vmem>>, vector<16x16xf32>
    %c0_15 = arith.constant 0 : index
    %c96 = arith.constant 96 : index
    %33 = vector.load %arg8[%c0_15, %c96] : memref<1x384xf32, #tpu.memory_space<vmem>>, vector<1x32xf32>
    %34 = vector.extract_strided_slice %29 {offsets = [0, 0], sizes = [16, 8], strides = [1, 1]} : vector<16x32xf32> to vector<16x8xf32>
    %35 = vector.extract_strided_slice %30 {offsets = [0, 0], sizes = [16, 8], strides = [1, 1]} : vector<16x32xf32> to vector<16x8xf32>
    %36 = vector.extract_strided_slice %31 {offsets = [0, 0], sizes = [16, 8], strides = [1, 1]} : vector<16x32xf32> to vector<16x8xf32>
    %cst_16 = arith.constant dense<0.000000e+00> : vector<16x16xf32>
    %37 = tpu.matmul %34, %35, %cst_16 {dimension_numbers = #tpu.dot_dimension_numbers<[1], [1], [0], [0], [0, 0, 1, 0], [], []>} : vector<16x8xf32>, vector<16x8xf32>, vector<16x16xf32> -> vector<16x16xf32>
    %cst_17 = arith.constant 0.353553385 : f32
    %38 = vector.broadcast %cst_17 : f32 to vector<16x16xf32>
    %39 = arith.mulf %37, %38 : vector<16x16xf32>
    %40 = arith.addf %39, %32 : vector<16x16xf32>
    %cst_18 = arith.constant dense<0xFF800000> : vector<16xf32>
    %41 = vector.multi_reduction <maximumf>, %40, %cst_18 [1] : vector<16x16xf32> to vector<16xf32>
    %42 = vector.shape_cast %41 : vector<16xf32> to vector<16x1xf32>
    %43 = vector.broadcast %42 : vector<16x1xf32> to vector<16x16xf32>
    %44 = arith.subf %40, %43 : vector<16x16xf32>
    %45 = math.exp %44 : vector<16x16xf32>
    %cst_19 = arith.constant dense<0.000000e+00> : vector<16xf32>
    %46 = vector.multi_reduction <add>, %45, %cst_19 [1] : vector<16x16xf32> to vector<16xf32>
    %47 = vector.shape_cast %46 : vector<16xf32> to vector<16x1xf32>
    %48 = tpu.reciprocal %47 {approx = true} : vector<16x1xf32> -> vector<16x1xf32>
    %cst_20 = arith.constant dense<0.000000e+00> : vector<16x8xf32>
    %49 = tpu.matmul %45, %36, %cst_20 {dimension_numbers = #tpu.dot_dimension_numbers<[1], [0], [0], [1], [0, 0, 1, 1], [], []>} : vector<16x16xf32>, vector<16x8xf32>, vector<16x8xf32> -> vector<16x8xf32>
    %50 = vector.broadcast %48 : vector<16x1xf32> to vector<16x8xf32>
    %51 = arith.mulf %49, %50 : vector<16x8xf32>
    %c0_21 = arith.constant 0 : index
    %c96_22 = arith.constant 96 : index
    %52 = vector.load %arg4[%c0_21, %c96_22] : memref<32x128xf32, #tpu.memory_space<vmem>>, vector<8x32xf32>
    %cst_23 = arith.constant dense<0.000000e+00> : vector<16x32xf32>
    %53 = tpu.matmul %51, %52, %cst_23 {dimension_numbers = #tpu.dot_dimension_numbers<[1], [0], [0], [1], [0, 0, 1, 1], [], []>} : vector<16x8xf32>, vector<8x32xf32>, vector<16x32xf32> -> vector<16x32xf32>
    %54 = vector.extract_strided_slice %29 {offsets = [0, 8], sizes = [16, 8], strides = [1, 1]} : vector<16x32xf32> to vector<16x8xf32>
    %55 = vector.extract_strided_slice %30 {offsets = [0, 8], sizes = [16, 8], strides = [1, 1]} : vector<16x32xf32> to vector<16x8xf32>
    %56 = vector.extract_strided_slice %31 {offsets = [0, 8], sizes = [16, 8], strides = [1, 1]} : vector<16x32xf32> to vector<16x8xf32>
    %cst_24 = arith.constant dense<0.000000e+00> : vector<16x16xf32>
    %57 = tpu.matmul %54, %55, %cst_24 {dimension_numbers = #tpu.dot_dimension_numbers<[1], [1], [0], [0], [0, 0, 1, 0], [], []>} : vector<16x8xf32>, vector<16x8xf32>, vector<16x16xf32> -> vector<16x16xf32>
    %cst_25 = arith.constant 0.353553385 : f32
    %58 = vector.broadcast %cst_25 : f32 to vector<16x16xf32>
    %59 = arith.mulf %57, %58 : vector<16x16xf32>
    %60 = arith.addf %59, %32 : vector<16x16xf32>
    %cst_26 = arith.constant dense<0xFF800000> : vector<16xf32>
    %61 = vector.multi_reduction <maximumf>, %60, %cst_26 [1] : vector<16x16xf32> to vector<16xf32>
    %62 = vector.shape_cast %61 : vector<16xf32> to vector<16x1xf32>
    %63 = vector.broadcast %62 : vector<16x1xf32> to vector<16x16xf32>
    %64 = arith.subf %60, %63 : vector<16x16xf32>
    %65 = math.exp %64 : vector<16x16xf32>
    %cst_27 = arith.constant dense<0.000000e+00> : vector<16xf32>
    %66 = vector.multi_reduction <add>, %65, %cst_27 [1] : vector<16x16xf32> to vector<16xf32>
    %67 = vector.shape_cast %66 : vector<16xf32> to vector<16x1xf32>
    %68 = tpu.reciprocal %67 {approx = true} : vector<16x1xf32> -> vector<16x1xf32>
    %cst_28 = arith.constant dense<0.000000e+00> : vector<16x8xf32>
    %69 = tpu.matmul %65, %56, %cst_28 {dimension_numbers = #tpu.dot_dimension_numbers<[1], [0], [0], [1], [0, 0, 1, 1], [], []>} : vector<16x16xf32>, vector<16x8xf32>, vector<16x8xf32> -> vector<16x8xf32>
    %70 = vector.broadcast %68 : vector<16x1xf32> to vector<16x8xf32>
    %71 = arith.mulf %69, %70 : vector<16x8xf32>
    %c8 = arith.constant 8 : index
    %c96_29 = arith.constant 96 : index
    %72 = vector.load %arg4[%c8, %c96_29] : memref<32x128xf32, #tpu.memory_space<vmem>>, vector<8x32xf32>
    %cst_30 = arith.constant dense<0.000000e+00> : vector<16x32xf32>
    %73 = tpu.matmul %71, %72, %cst_30 {dimension_numbers = #tpu.dot_dimension_numbers<[1], [0], [0], [1], [0, 0, 1, 1], [], []>} : vector<16x8xf32>, vector<8x32xf32>, vector<16x32xf32> -> vector<16x32xf32>
    %74 = arith.addf %53, %73 : vector<16x32xf32>
    %75 = vector.extract_strided_slice %29 {offsets = [0, 16], sizes = [16, 8], strides = [1, 1]} : vector<16x32xf32> to vector<16x8xf32>
    %76 = vector.extract_strided_slice %30 {offsets = [0, 16], sizes = [16, 8], strides = [1, 1]} : vector<16x32xf32> to vector<16x8xf32>
    %77 = vector.extract_strided_slice %31 {offsets = [0, 16], sizes = [16, 8], strides = [1, 1]} : vector<16x32xf32> to vector<16x8xf32>
    %cst_31 = arith.constant dense<0.000000e+00> : vector<16x16xf32>
    %78 = tpu.matmul %75, %76, %cst_31 {dimension_numbers = #tpu.dot_dimension_numbers<[1], [1], [0], [0], [0, 0, 1, 0], [], []>} : vector<16x8xf32>, vector<16x8xf32>, vector<16x16xf32> -> vector<16x16xf32>
    %cst_32 = arith.constant 0.353553385 : f32
    %79 = vector.broadcast %cst_32 : f32 to vector<16x16xf32>
    %80 = arith.mulf %78, %79 : vector<16x16xf32>
    %81 = arith.addf %80, %32 : vector<16x16xf32>
    %cst_33 = arith.constant dense<0xFF800000> : vector<16xf32>
    %82 = vector.multi_reduction <maximumf>, %81, %cst_33 [1] : vector<16x16xf32> to vector<16xf32>
    %83 = vector.shape_cast %82 : vector<16xf32> to vector<16x1xf32>
    %84 = vector.broadcast %83 : vector<16x1xf32> to vector<16x16xf32>
    %85 = arith.subf %81, %84 : vector<16x16xf32>
    %86 = math.exp %85 : vector<16x16xf32>
    %cst_34 = arith.constant dense<0.000000e+00> : vector<16xf32>
    %87 = vector.multi_reduction <add>, %86, %cst_34 [1] : vector<16x16xf32> to vector<16xf32>
    %88 = vector.shape_cast %87 : vector<16xf32> to vector<16x1xf32>
    %89 = tpu.reciprocal %88 {approx = true} : vector<16x1xf32> -> vector<16x1xf32>
    %cst_35 = arith.constant dense<0.000000e+00> : vector<16x8xf32>
    %90 = tpu.matmul %86, %77, %cst_35 {dimension_numbers = #tpu.dot_dimension_numbers<[1], [0], [0], [1], [0, 0, 1, 1], [], []>} : vector<16x16xf32>, vector<16x8xf32>, vector<16x8xf32> -> vector<16x8xf32>
    %91 = vector.broadcast %89 : vector<16x1xf32> to vector<16x8xf32>
    %92 = arith.mulf %90, %91 : vector<16x8xf32>
    %c16 = arith.constant 16 : index
    %c96_36 = arith.constant 96 : index
    %93 = vector.load %arg4[%c16, %c96_36] : memref<32x128xf32, #tpu.memory_space<vmem>>, vector<8x32xf32>
    %cst_37 = arith.constant dense<0.000000e+00> : vector<16x32xf32>
    %94 = tpu.matmul %92, %93, %cst_37 {dimension_numbers = #tpu.dot_dimension_numbers<[1], [0], [0], [1], [0, 0, 1, 1], [], []>} : vector<16x8xf32>, vector<8x32xf32>, vector<16x32xf32> -> vector<16x32xf32>
    %95 = arith.addf %74, %94 : vector<16x32xf32>
    %96 = vector.extract_strided_slice %29 {offsets = [0, 24], sizes = [16, 8], strides = [1, 1]} : vector<16x32xf32> to vector<16x8xf32>
    %97 = vector.extract_strided_slice %30 {offsets = [0, 24], sizes = [16, 8], strides = [1, 1]} : vector<16x32xf32> to vector<16x8xf32>
    %98 = vector.extract_strided_slice %31 {offsets = [0, 24], sizes = [16, 8], strides = [1, 1]} : vector<16x32xf32> to vector<16x8xf32>
    %cst_38 = arith.constant dense<0.000000e+00> : vector<16x16xf32>
    %99 = tpu.matmul %96, %97, %cst_38 {dimension_numbers = #tpu.dot_dimension_numbers<[1], [1], [0], [0], [0, 0, 1, 0], [], []>} : vector<16x8xf32>, vector<16x8xf32>, vector<16x16xf32> -> vector<16x16xf32>
    %cst_39 = arith.constant 0.353553385 : f32
    %100 = vector.broadcast %cst_39 : f32 to vector<16x16xf32>
    %101 = arith.mulf %99, %100 : vector<16x16xf32>
    %102 = arith.addf %101, %32 : vector<16x16xf32>
    %cst_40 = arith.constant dense<0xFF800000> : vector<16xf32>
    %103 = vector.multi_reduction <maximumf>, %102, %cst_40 [1] : vector<16x16xf32> to vector<16xf32>
    %104 = vector.shape_cast %103 : vector<16xf32> to vector<16x1xf32>
    %105 = vector.broadcast %104 : vector<16x1xf32> to vector<16x16xf32>
    %106 = arith.subf %102, %105 : vector<16x16xf32>
    %107 = math.exp %106 : vector<16x16xf32>
    %cst_41 = arith.constant dense<0.000000e+00> : vector<16xf32>
    %108 = vector.multi_reduction <add>, %107, %cst_41 [1] : vector<16x16xf32> to vector<16xf32>
    %109 = vector.shape_cast %108 : vector<16xf32> to vector<16x1xf32>
    %110 = tpu.reciprocal %109 {approx = true} : vector<16x1xf32> -> vector<16x1xf32>
    %cst_42 = arith.constant dense<0.000000e+00> : vector<16x8xf32>
    %111 = tpu.matmul %107, %98, %cst_42 {dimension_numbers = #tpu.dot_dimension_numbers<[1], [0], [0], [1], [0, 0, 1, 1], [], []>} : vector<16x16xf32>, vector<16x8xf32>, vector<16x8xf32> -> vector<16x8xf32>
    %112 = vector.broadcast %110 : vector<16x1xf32> to vector<16x8xf32>
    %113 = arith.mulf %111, %112 : vector<16x8xf32>
    %c24 = arith.constant 24 : index
    %c96_43 = arith.constant 96 : index
    %114 = vector.load %arg4[%c24, %c96_43] : memref<32x128xf32, #tpu.memory_space<vmem>>, vector<8x32xf32>
    %cst_44 = arith.constant dense<0.000000e+00> : vector<16x32xf32>
    %115 = tpu.matmul %113, %114, %cst_44 {dimension_numbers = #tpu.dot_dimension_numbers<[1], [0], [0], [1], [0, 0, 1, 1], [], []>} : vector<16x8xf32>, vector<8x32xf32>, vector<16x32xf32> -> vector<16x32xf32>
    %116 = arith.addf %95, %115 : vector<16x32xf32>
    %117 = vector.broadcast %33 : vector<1x32xf32> to vector<16x32xf32>
    %118 = arith.addf %116, %117 : vector<16x32xf32>
    %119 = arith.addf %0, %118 : vector<16x32xf32>
    %c1 = arith.constant 1 : index
    %120 = memref.load %arg9[%c1] : memref<8xf32, #tpu.memory_space<smem>>
    %c4 = arith.constant 4 : index
    %121 = memref.load %arg9[%c4] : memref<8xf32, #tpu.memory_space<smem>>
    %cst_45 = arith.constant dense<0.000000e+00> : vector<16xf32>
    %122 = vector.multi_reduction <add>, %119, %cst_45 [1] : vector<16x32xf32> to vector<16xf32>
    %123 = vector.shape_cast %122 : vector<16xf32> to vector<16x1xf32>
    %cst_46 = arith.constant 3.200000e+01 : f32
    %124 = vector.broadcast %cst_46 : f32 to vector<16x1xf32>
    %125 = arith.divf %123, %124 : vector<16x1xf32>
    %126 = vector.broadcast %125 : vector<16x1xf32> to vector<16x32xf32>
    %127 = arith.subf %119, %126 : vector<16x32xf32>
    %128 = arith.mulf %127, %127 : vector<16x32xf32>
    %cst_47 = arith.constant dense<0.000000e+00> : vector<16xf32>
    %129 = vector.multi_reduction <add>, %128, %cst_47 [1] : vector<16x32xf32> to vector<16xf32>
    %130 = vector.shape_cast %129 : vector<16xf32> to vector<16x1xf32>
    %cst_48 = arith.constant 0.0322580636 : f32
    %131 = vector.broadcast %cst_48 : f32 to vector<16x1xf32>
    %132 = arith.mulf %130, %131 : vector<16x1xf32>
    %133 = vector.broadcast %120 : f32 to vector<16x32xf32>
    %134 = arith.mulf %133, %127 : vector<16x32xf32>
    %cst_49 = arith.constant 9.99999997E-7 : f32
    %135 = vector.broadcast %cst_49 : f32 to vector<16x1xf32>
    %136 = arith.addf %132, %135 : vector<16x1xf32>
    %137 = math.rsqrt %136 : vector<16x1xf32>
    %138 = vector.broadcast %137 : vector<16x1xf32> to vector<16x32xf32>
    %139 = arith.mulf %134, %138 : vector<16x32xf32>
    %140 = vector.broadcast %121 : f32 to vector<16x32xf32>
    %141 = arith.addf %139, %140 : vector<16x32xf32>
    %c0_50 = arith.constant 0 : index
    %c0_51 = arith.constant 0 : index
    %142 = vector.load %arg5[%c0_50, %c0_51] : memref<32x128xf32, #tpu.memory_space<vmem>>, vector<32x32xf32>
    %cst_52 = arith.constant dense<0.000000e+00> : vector<16x32xf32>
    %143 = tpu.matmul %141, %142, %cst_52 {dimension_numbers = #tpu.dot_dimension_numbers<[1], [0], [0], [1], [0, 0, 1, 1], [], []>} : vector<16x32xf32>, vector<32x32xf32>, vector<16x32xf32> -> vector<16x32xf32>
    %c0_53 = arith.constant 0 : index
    %c128 = arith.constant 128 : index
    %144 = vector.load %arg8[%c0_53, %c128] : memref<1x384xf32, #tpu.memory_space<vmem>>, vector<1x32xf32>
    %145 = vector.broadcast %144 : vector<1x32xf32> to vector<16x32xf32>
    %146 = arith.addf %143, %145 : vector<16x32xf32>
    %c0_54 = arith.constant 0 : index
    %c32 = arith.constant 32 : index
    %147 = vector.load %arg5[%c0_54, %c32] : memref<32x128xf32, #tpu.memory_space<vmem>>, vector<32x64xf32>
    %cst_55 = arith.constant dense<0.000000e+00> : vector<16x64xf32>
    %148 = tpu.matmul %1, %147, %cst_55 {dimension_numbers = #tpu.dot_dimension_numbers<[1], [0], [0], [1], [0, 0, 1, 1], [], []>} : vector<16x32xf32>, vector<32x64xf32>, vector<16x64xf32> -> vector<16x64xf32>
    %c0_56 = arith.constant 0 : index
    %c160 = arith.constant 160 : index
    %149 = vector.load %arg8[%c0_56, %c160] : memref<1x384xf32, #tpu.memory_space<vmem>>, vector<1x64xf32>
    %150 = vector.broadcast %149 : vector<1x64xf32> to vector<16x64xf32>
    %151 = arith.addf %148, %150 : vector<16x64xf32>
    %152 = vector.extract_strided_slice %151 {offsets = [0, 0], sizes = [16, 32], strides = [1, 1]} : vector<16x64xf32> to vector<16x32xf32>
    %153 = vector.extract_strided_slice %151 {offsets = [0, 32], sizes = [16, 32], strides = [1, 1]} : vector<16x64xf32> to vector<16x32xf32>
    %c0_57 = arith.constant 0 : index
    %c0_58 = arith.constant 0 : index
    %154 = vector.load %arg3[%c0_57, %c0_58] : memref<16x16xf32, #tpu.memory_space<vmem>>, vector<16x16xf32>
    %c0_59 = arith.constant 0 : index
    %c224 = arith.constant 224 : index
    %155 = vector.load %arg8[%c0_59, %c224] : memref<1x384xf32, #tpu.memory_space<vmem>>, vector<1x32xf32>
    %156 = vector.extract_strided_slice %146 {offsets = [0, 0], sizes = [16, 8], strides = [1, 1]} : vector<16x32xf32> to vector<16x8xf32>
    %157 = vector.extract_strided_slice %152 {offsets = [0, 0], sizes = [16, 8], strides = [1, 1]} : vector<16x32xf32> to vector<16x8xf32>
    %158 = vector.extract_strided_slice %153 {offsets = [0, 0], sizes = [16, 8], strides = [1, 1]} : vector<16x32xf32> to vector<16x8xf32>
    %cst_60 = arith.constant dense<0.000000e+00> : vector<16x16xf32>
    %159 = tpu.matmul %156, %157, %cst_60 {dimension_numbers = #tpu.dot_dimension_numbers<[1], [1], [0], [0], [0, 0, 1, 0], [], []>} : vector<16x8xf32>, vector<16x8xf32>, vector<16x16xf32> -> vector<16x16xf32>
    %cst_61 = arith.constant 0.353553385 : f32
    %160 = vector.broadcast %cst_61 : f32 to vector<16x16xf32>
    %161 = arith.mulf %159, %160 : vector<16x16xf32>
    %162 = arith.addf %161, %154 : vector<16x16xf32>
    %cst_62 = arith.constant dense<0xFF800000> : vector<16xf32>
    %163 = vector.multi_reduction <maximumf>, %162, %cst_62 [1] : vector<16x16xf32> to vector<16xf32>
    %164 = vector.shape_cast %163 : vector<16xf32> to vector<16x1xf32>
    %165 = vector.broadcast %164 : vector<16x1xf32> to vector<16x16xf32>
    %166 = arith.subf %162, %165 : vector<16x16xf32>
    %167 = math.exp %166 : vector<16x16xf32>
    %cst_63 = arith.constant dense<0.000000e+00> : vector<16xf32>
    %168 = vector.multi_reduction <add>, %167, %cst_63 [1] : vector<16x16xf32> to vector<16xf32>
    %169 = vector.shape_cast %168 : vector<16xf32> to vector<16x1xf32>
    %170 = tpu.reciprocal %169 {approx = true} : vector<16x1xf32> -> vector<16x1xf32>
    %cst_64 = arith.constant dense<0.000000e+00> : vector<16x8xf32>
    %171 = tpu.matmul %167, %158, %cst_64 {dimension_numbers = #tpu.dot_dimension_numbers<[1], [0], [0], [1], [0, 0, 1, 1], [], []>} : vector<16x16xf32>, vector<16x8xf32>, vector<16x8xf32> -> vector<16x8xf32>
    %172 = vector.broadcast %170 : vector<16x1xf32> to vector<16x8xf32>
    %173 = arith.mulf %171, %172 : vector<16x8xf32>
    %c0_65 = arith.constant 0 : index
    %c96_66 = arith.constant 96 : index
    %174 = vector.load %arg5[%c0_65, %c96_66] : memref<32x128xf32, #tpu.memory_space<vmem>>, vector<8x32xf32>
    %cst_67 = arith.constant dense<0.000000e+00> : vector<16x32xf32>
    %175 = tpu.matmul %173, %174, %cst_67 {dimension_numbers = #tpu.dot_dimension_numbers<[1], [0], [0], [1], [0, 0, 1, 1], [], []>} : vector<16x8xf32>, vector<8x32xf32>, vector<16x32xf32> -> vector<16x32xf32>
    %176 = vector.extract_strided_slice %146 {offsets = [0, 8], sizes = [16, 8], strides = [1, 1]} : vector<16x32xf32> to vector<16x8xf32>
    %177 = vector.extract_strided_slice %152 {offsets = [0, 8], sizes = [16, 8], strides = [1, 1]} : vector<16x32xf32> to vector<16x8xf32>
    %178 = vector.extract_strided_slice %153 {offsets = [0, 8], sizes = [16, 8], strides = [1, 1]} : vector<16x32xf32> to vector<16x8xf32>
    %cst_68 = arith.constant dense<0.000000e+00> : vector<16x16xf32>
    %179 = tpu.matmul %176, %177, %cst_68 {dimension_numbers = #tpu.dot_dimension_numbers<[1], [1], [0], [0], [0, 0, 1, 0], [], []>} : vector<16x8xf32>, vector<16x8xf32>, vector<16x16xf32> -> vector<16x16xf32>
    %cst_69 = arith.constant 0.353553385 : f32
    %180 = vector.broadcast %cst_69 : f32 to vector<16x16xf32>
    %181 = arith.mulf %179, %180 : vector<16x16xf32>
    %182 = arith.addf %181, %154 : vector<16x16xf32>
    %cst_70 = arith.constant dense<0xFF800000> : vector<16xf32>
    %183 = vector.multi_reduction <maximumf>, %182, %cst_70 [1] : vector<16x16xf32> to vector<16xf32>
    %184 = vector.shape_cast %183 : vector<16xf32> to vector<16x1xf32>
    %185 = vector.broadcast %184 : vector<16x1xf32> to vector<16x16xf32>
    %186 = arith.subf %182, %185 : vector<16x16xf32>
    %187 = math.exp %186 : vector<16x16xf32>
    %cst_71 = arith.constant dense<0.000000e+00> : vector<16xf32>
    %188 = vector.multi_reduction <add>, %187, %cst_71 [1] : vector<16x16xf32> to vector<16xf32>
    %189 = vector.shape_cast %188 : vector<16xf32> to vector<16x1xf32>
    %190 = tpu.reciprocal %189 {approx = true} : vector<16x1xf32> -> vector<16x1xf32>
    %cst_72 = arith.constant dense<0.000000e+00> : vector<16x8xf32>
    %191 = tpu.matmul %187, %178, %cst_72 {dimension_numbers = #tpu.dot_dimension_numbers<[1], [0], [0], [1], [0, 0, 1, 1], [], []>} : vector<16x16xf32>, vector<16x8xf32>, vector<16x8xf32> -> vector<16x8xf32>
    %192 = vector.broadcast %190 : vector<16x1xf32> to vector<16x8xf32>
    %193 = arith.mulf %191, %192 : vector<16x8xf32>
    %c8_73 = arith.constant 8 : index
    %c96_74 = arith.constant 96 : index
    %194 = vector.load %arg5[%c8_73, %c96_74] : memref<32x128xf32, #tpu.memory_space<vmem>>, vector<8x32xf32>
    %cst_75 = arith.constant dense<0.000000e+00> : vector<16x32xf32>
    %195 = tpu.matmul %193, %194, %cst_75 {dimension_numbers = #tpu.dot_dimension_numbers<[1], [0], [0], [1], [0, 0, 1, 1], [], []>} : vector<16x8xf32>, vector<8x32xf32>, vector<16x32xf32> -> vector<16x32xf32>
    %196 = arith.addf %175, %195 : vector<16x32xf32>
    %197 = vector.extract_strided_slice %146 {offsets = [0, 16], sizes = [16, 8], strides = [1, 1]} : vector<16x32xf32> to vector<16x8xf32>
    %198 = vector.extract_strided_slice %152 {offsets = [0, 16], sizes = [16, 8], strides = [1, 1]} : vector<16x32xf32> to vector<16x8xf32>
    %199 = vector.extract_strided_slice %153 {offsets = [0, 16], sizes = [16, 8], strides = [1, 1]} : vector<16x32xf32> to vector<16x8xf32>
    %cst_76 = arith.constant dense<0.000000e+00> : vector<16x16xf32>
    %200 = tpu.matmul %197, %198, %cst_76 {dimension_numbers = #tpu.dot_dimension_numbers<[1], [1], [0], [0], [0, 0, 1, 0], [], []>} : vector<16x8xf32>, vector<16x8xf32>, vector<16x16xf32> -> vector<16x16xf32>
    %cst_77 = arith.constant 0.353553385 : f32
    %201 = vector.broadcast %cst_77 : f32 to vector<16x16xf32>
    %202 = arith.mulf %200, %201 : vector<16x16xf32>
    %203 = arith.addf %202, %154 : vector<16x16xf32>
    %cst_78 = arith.constant dense<0xFF800000> : vector<16xf32>
    %204 = vector.multi_reduction <maximumf>, %203, %cst_78 [1] : vector<16x16xf32> to vector<16xf32>
    %205 = vector.shape_cast %204 : vector<16xf32> to vector<16x1xf32>
    %206 = vector.broadcast %205 : vector<16x1xf32> to vector<16x16xf32>
    %207 = arith.subf %203, %206 : vector<16x16xf32>
    %208 = math.exp %207 : vector<16x16xf32>
    %cst_79 = arith.constant dense<0.000000e+00> : vector<16xf32>
    %209 = vector.multi_reduction <add>, %208, %cst_79 [1] : vector<16x16xf32> to vector<16xf32>
    %210 = vector.shape_cast %209 : vector<16xf32> to vector<16x1xf32>
    %211 = tpu.reciprocal %210 {approx = true} : vector<16x1xf32> -> vector<16x1xf32>
    %cst_80 = arith.constant dense<0.000000e+00> : vector<16x8xf32>
    %212 = tpu.matmul %208, %199, %cst_80 {dimension_numbers = #tpu.dot_dimension_numbers<[1], [0], [0], [1], [0, 0, 1, 1], [], []>} : vector<16x16xf32>, vector<16x8xf32>, vector<16x8xf32> -> vector<16x8xf32>
    %213 = vector.broadcast %211 : vector<16x1xf32> to vector<16x8xf32>
    %214 = arith.mulf %212, %213 : vector<16x8xf32>
    %c16_81 = arith.constant 16 : index
    %c96_82 = arith.constant 96 : index
    %215 = vector.load %arg5[%c16_81, %c96_82] : memref<32x128xf32, #tpu.memory_space<vmem>>, vector<8x32xf32>
    %cst_83 = arith.constant dense<0.000000e+00> : vector<16x32xf32>
    %216 = tpu.matmul %214, %215, %cst_83 {dimension_numbers = #tpu.dot_dimension_numbers<[1], [0], [0], [1], [0, 0, 1, 1], [], []>} : vector<16x8xf32>, vector<8x32xf32>, vector<16x32xf32> -> vector<16x32xf32>
    %217 = arith.addf %196, %216 : vector<16x32xf32>
    %218 = vector.extract_strided_slice %146 {offsets = [0, 24], sizes = [16, 8], strides = [1, 1]} : vector<16x32xf32> to vector<16x8xf32>
    %219 = vector.extract_strided_slice %152 {offsets = [0, 24], sizes = [16, 8], strides = [1, 1]} : vector<16x32xf32> to vector<16x8xf32>
    %220 = vector.extract_strided_slice %153 {offsets = [0, 24], sizes = [16, 8], strides = [1, 1]} : vector<16x32xf32> to vector<16x8xf32>
    %cst_84 = arith.constant dense<0.000000e+00> : vector<16x16xf32>
    %221 = tpu.matmul %218, %219, %cst_84 {dimension_numbers = #tpu.dot_dimension_numbers<[1], [1], [0], [0], [0, 0, 1, 0], [], []>} : vector<16x8xf32>, vector<16x8xf32>, vector<16x16xf32> -> vector<16x16xf32>
    %cst_85 = arith.constant 0.353553385 : f32
    %222 = vector.broadcast %cst_85 : f32 to vector<16x16xf32>
    %223 = arith.mulf %221, %222 : vector<16x16xf32>
    %224 = arith.addf %223, %154 : vector<16x16xf32>
    %cst_86 = arith.constant dense<0xFF800000> : vector<16xf32>
    %225 = vector.multi_reduction <maximumf>, %224, %cst_86 [1] : vector<16x16xf32> to vector<16xf32>
    %226 = vector.shape_cast %225 : vector<16xf32> to vector<16x1xf32>
    %227 = vector.broadcast %226 : vector<16x1xf32> to vector<16x16xf32>
    %228 = arith.subf %224, %227 : vector<16x16xf32>
    %229 = math.exp %228 : vector<16x16xf32>
    %cst_87 = arith.constant dense<0.000000e+00> : vector<16xf32>
    %230 = vector.multi_reduction <add>, %229, %cst_87 [1] : vector<16x16xf32> to vector<16xf32>
    %231 = vector.shape_cast %230 : vector<16xf32> to vector<16x1xf32>
    %232 = tpu.reciprocal %231 {approx = true} : vector<16x1xf32> -> vector<16x1xf32>
    %cst_88 = arith.constant dense<0.000000e+00> : vector<16x8xf32>
    %233 = tpu.matmul %229, %220, %cst_88 {dimension_numbers = #tpu.dot_dimension_numbers<[1], [0], [0], [1], [0, 0, 1, 1], [], []>} : vector<16x16xf32>, vector<16x8xf32>, vector<16x8xf32> -> vector<16x8xf32>
    %234 = vector.broadcast %232 : vector<16x1xf32> to vector<16x8xf32>
    %235 = arith.mulf %233, %234 : vector<16x8xf32>
    %c24_89 = arith.constant 24 : index
    %c96_90 = arith.constant 96 : index
    %236 = vector.load %arg5[%c24_89, %c96_90] : memref<32x128xf32, #tpu.memory_space<vmem>>, vector<8x32xf32>
    %cst_91 = arith.constant dense<0.000000e+00> : vector<16x32xf32>
    %237 = tpu.matmul %235, %236, %cst_91 {dimension_numbers = #tpu.dot_dimension_numbers<[1], [0], [0], [1], [0, 0, 1, 1], [], []>} : vector<16x8xf32>, vector<8x32xf32>, vector<16x32xf32> -> vector<16x32xf32>
    %238 = arith.addf %217, %237 : vector<16x32xf32>
    %239 = vector.broadcast %155 : vector<1x32xf32> to vector<16x32xf32>
    %240 = arith.addf %238, %239 : vector<16x32xf32>
    %241 = arith.addf %119, %240 : vector<16x32xf32>
    %c2 = arith.constant 2 : index
    %242 = memref.load %arg9[%c2] : memref<8xf32, #tpu.memory_space<smem>>
    %c5 = arith.constant 5 : index
    %243 = memref.load %arg9[%c5] : memref<8xf32, #tpu.memory_space<smem>>
    %cst_92 = arith.constant dense<0.000000e+00> : vector<16xf32>
    %244 = vector.multi_reduction <add>, %241, %cst_92 [1] : vector<16x32xf32> to vector<16xf32>
    %245 = vector.shape_cast %244 : vector<16xf32> to vector<16x1xf32>
    %cst_93 = arith.constant 3.200000e+01 : f32
    %246 = vector.broadcast %cst_93 : f32 to vector<16x1xf32>
    %247 = arith.divf %245, %246 : vector<16x1xf32>
    %248 = vector.broadcast %247 : vector<16x1xf32> to vector<16x32xf32>
    %249 = arith.subf %241, %248 : vector<16x32xf32>
    %250 = arith.mulf %249, %249 : vector<16x32xf32>
    %cst_94 = arith.constant dense<0.000000e+00> : vector<16xf32>
    %251 = vector.multi_reduction <add>, %250, %cst_94 [1] : vector<16x32xf32> to vector<16xf32>
    %252 = vector.shape_cast %251 : vector<16xf32> to vector<16x1xf32>
    %cst_95 = arith.constant 0.0322580636 : f32
    %253 = vector.broadcast %cst_95 : f32 to vector<16x1xf32>
    %254 = arith.mulf %252, %253 : vector<16x1xf32>
    %255 = vector.broadcast %242 : f32 to vector<16x32xf32>
    %256 = arith.mulf %255, %249 : vector<16x32xf32>
    %cst_96 = arith.constant 9.99999997E-7 : f32
    %257 = vector.broadcast %cst_96 : f32 to vector<16x1xf32>
    %258 = arith.addf %254, %257 : vector<16x1xf32>
    %259 = math.rsqrt %258 : vector<16x1xf32>
    %260 = vector.broadcast %259 : vector<16x1xf32> to vector<16x32xf32>
    %261 = arith.mulf %256, %260 : vector<16x32xf32>
    %262 = vector.broadcast %243 : f32 to vector<16x32xf32>
    %263 = arith.addf %261, %262 : vector<16x32xf32>
    %c0_97 = arith.constant 0 : index
    %c0_98 = arith.constant 0 : index
    %264 = vector.load %arg6[%c0_97, %c0_98] : memref<32x64xf32, #tpu.memory_space<vmem>>, vector<32x64xf32>
    %cst_99 = arith.constant dense<0.000000e+00> : vector<16x64xf32>
    %265 = tpu.matmul %263, %264, %cst_99 {dimension_numbers = #tpu.dot_dimension_numbers<[1], [0], [0], [1], [0, 0, 1, 1], [], []>} : vector<16x32xf32>, vector<32x64xf32>, vector<16x64xf32> -> vector<16x64xf32>
    %c0_100 = arith.constant 0 : index
    %c256 = arith.constant 256 : index
    %266 = vector.load %arg8[%c0_100, %c256] : memref<1x384xf32, #tpu.memory_space<vmem>>, vector<1x64xf32>
    %267 = vector.broadcast %266 : vector<1x64xf32> to vector<16x64xf32>
    %268 = arith.addf %265, %267 : vector<16x64xf32>
    %cst_101 = arith.constant 0.000000e+00 : f32
    %269 = vector.broadcast %cst_101 : f32 to vector<16x64xf32>
    %270 = arith.maximumf %268, %269 : vector<16x64xf32>
    %c0_102 = arith.constant 0 : index
    %c0_103 = arith.constant 0 : index
    %271 = vector.load %arg7[%c0_102, %c0_103] : memref<64x32xf32, #tpu.memory_space<vmem>>, vector<64x32xf32>
    %cst_104 = arith.constant dense<0.000000e+00> : vector<16x32xf32>
    %272 = tpu.matmul %270, %271, %cst_104 {dimension_numbers = #tpu.dot_dimension_numbers<[1], [0], [0], [1], [0, 0, 1, 1], [], []>} : vector<16x64xf32>, vector<64x32xf32>, vector<16x32xf32> -> vector<16x32xf32>
    %c0_105 = arith.constant 0 : index
    %c320 = arith.constant 320 : index
    %273 = vector.load %arg8[%c0_105, %c320] : memref<1x384xf32, #tpu.memory_space<vmem>>, vector<1x32xf32>
    %274 = vector.broadcast %273 : vector<1x32xf32> to vector<16x32xf32>
    %275 = arith.addf %272, %274 : vector<16x32xf32>
    %276 = arith.addf %241, %275 : vector<16x32xf32>
    %c0_106 = arith.constant 0 : index
    %c0_107 = arith.constant 0 : index
    %277 = vector.load %arg10[%c0_106, %c0_107] : memref<16x32xf32, #tpu.memory_space<vmem>>, vector<16x32xf32>
    tpu.vector_store %arg10[%c0_106, %c0_107], %276 {strides = array<i32>} : memref<16x32xf32, #tpu.memory_space<vmem>>, vector<16x32xf32>,
    return
  }
}

</mosaic_0001>

<bundles_post_ra>
// kernel: tpu_custom_call.1
= control target key start
LH: loop header
LB: loop body
LE: loop exit
PB: predicated region body
PF: predicated region fallthrough
CT: control target
= control target key end

     0   :  { %15 = vsyncpa [#allocation3], 0  ;;  %s4484_s0 = inlined_call_operand.hbm [shape: f32[16,32], index: 0, kind: input, shape index: {}]   ;;  %s4485_s1 = inlined_call_operand.hbm [shape: f32[16,32], index: 1, kind: input, shape index: {}]   ;;  %s4486_s2 = inlined_call_operand.hbm [shape: f32[16,16], index: 2, kind: input, shape index: {}]   ;;  %s4487_s3 = inlined_call_operand.hbm [shape: f32[16,16], index: 3, kind: input, shape index: {}]   ;;  %s4488_s4 = inlined_call_operand.vmem [shape: f32[32,128], index: 4, kind: input, shape index: {}]   ;;  %s4489_s5 = inlined_call_operand.vmem [shape: f32[32,128], index: 5, kind: input, shape index: {}]   ;;  %s4490_s6 = inlined_call_operand.vmem [shape: f32[32,64], index: 6, kind: input, shape index: {}]   ;;  %s4491_s7 = inlined_call_operand.vmem [shape: f32[64,32], index: 7, kind: input, shape index: {}]   ;;  %s4492_s8 = inlined_call_operand.vmem [shape: f32[1,384], index: 8, kind: input, shape index: {}]   ;;  %s4493_s9 = inlined_call_operand.vmem [shape: f32[8], index: 9, kind: input, shape index: {}]   ;;  %s4494_s10 = inlined_call_operand.hbm [shape: f32[16,32], index: 10, kind: output, shape index: {}]  }
   0x1   :  { %16 = vsyncpa [#allocation7], 0 }
   0x2   :  { %17 = vsyncpa [#allocation10], 0 }
   0x3   :  { %18 = vsyncpa [#allocation5], 0 }
   0x4   :  { %19 = vsyncpa [#allocation4], 0  ;;  %s3918_s13 = smov [#allocation6]   ;;  %s3919_s15 = smov [#allocation2]  }
   0x5   :  { %s37_s14 = sshll.u32 %s3918_s13, 4  ;;  %s25_s16 = sshll.u32 %s3919_s15, 4  ;;  %s38_s14 = int_to_ptr.vmem [resolvable:$true] %s37_s14  ;;  %s3993_s16 = int_to_ptr.vmem [resolvable:$true] %s25_s16 }
   0x6   :  { %s3786_s19 = scalar_lea.hbm %s4485_s1, 256 }
   0x7   :  { %p3787_p0 = scmp.ne.s32.totalorder %s4485_s1, %s3786_s19  ;;  %p3790_p1 = scmp.lt.u32.totalorder %s3786_s19, %s4485_s1 }
   0x9   :  { %p3792_p2 = pnand %p3790_p1, %p3787_p0 }
   0xb   :  { %3795 = shalt.err (!%p3792_p2)
}
   0xc   :  { %s3796_s24 = scalar_lea.vmem %s38_s14, 256  ;;  %p3801_p4 = scmp.lt.s32.totalorder %s38_s14, %s38_s14 }
   0xd   :  { %p3797_p3 = scmp.ne.s32.totalorder %s38_s14, %s3796_s24  ;;  %p3802_p5 = scmp.lt.s32.totalorder %s3796_s24, %s3796_s24 }
   0xf   :  { %p3803_p6 = por %p3802_p5, %p3801_p4 }
  0x11   :  { %p3804_p7 = pnand %p3803_p6, %p3797_p3 }
  0x13   :  { %3807 = shalt.err (!%p3804_p7)
}
  0x14   :  { %s3920_s25 = smov 128   ;;  %s3921_s26 = smov 8  }
  0x15   :  { %43 = dma.hbm_to_vmem [thread:$0]  %s4485_s1, 256, %s38_s14, [#allocation7], %s3920_s25, %s3920_s25, %s3921_s26  }
  0x16   :  { %s3808_s11 = scalar_lea.hbm %s4484_s0, 256 }
  0x17   :  { %p3809_p8 = scmp.ne.s32.totalorder %s4484_s0, %s3808_s11  ;;  %p3812_p9 = scmp.lt.u32.totalorder %s3808_s11, %s4484_s0 }
  0x19   :  { %p3814_p10 = pnand %p3812_p9, %p3809_p8 }
  0x1b   :  { %3817 = shalt.err (!%p3814_p10)
}
  0x1c   :  { %s3818_s18 = scalar_lea.vmem %s3993_s16, 256  ;;  %p3823_p12 = scmp.lt.s32.totalorder %s3993_s16, %s3993_s16 }
  0x1d   :  { %p3819_p11 = scmp.ne.s32.totalorder %s3993_s16, %s3818_s18  ;;  %p3824_p13 = scmp.lt.s32.totalorder %s3818_s18, %s3818_s18 }
  0x1f   :  { %p3825_p0 = por %p3824_p13, %p3823_p12 }
  0x21   :  { %p3826_p1 = pnand %p3825_p0, %p3819_p11 }
  0x23   :  { %3829 = shalt.err (!%p3826_p1)
}
  0x24   :  { %31 = dma.hbm_to_vmem [thread:$0]  %s4484_s0, 256, %s3993_s16, [#allocation3], %s3920_s25, %s3920_s25, %s3921_s26  }
  0x25   :  { %s3922_s19 = smov [#allocation8]   ;;  %s3923_s21 = smov [#allocation9]  }
  0x26   :  { %s49_s20 = sshll.u32 %s3922_s19, 4  ;;  %s61_s22 = sshll.u32 %s3923_s21, 4  ;;  %s50_s20 = int_to_ptr.vmem [resolvable:$true] %s49_s20  ;;  %s4030_s22 = int_to_ptr.vmem [resolvable:$true] %s61_s22 }
  0x27   :  { %s3830_s27 = scalar_lea.hbm %s4486_s2, 256 }
  0x28   :  { %p3831_p2 = scmp.ne.s32.totalorder %s4486_s2, %s3830_s27  ;;  %p3834_p3 = scmp.lt.u32.totalorder %s3830_s27, %s4486_s2 }
  0x2a   :  { %p3836_p4 = pnand %p3834_p3, %p3831_p2 }
  0x2c   :  { %3839 = shalt.err (!%p3836_p4)
}
  0x2d   :  { %s3840_s0 = scalar_lea.vmem %s50_s20, 256  ;;  %p3845_p6 = scmp.lt.s32.totalorder %s50_s20, %s50_s20 }
  0x2e   :  { %p3841_p5 = scmp.ne.s32.totalorder %s50_s20, %s3840_s0  ;;  %p3846_p7 = scmp.lt.s32.totalorder %s3840_s0, %s3840_s0 }
  0x30   :  { %p3847_p8 = por %p3846_p7, %p3845_p6 }
  0x32   :  { %p3848_p9 = pnand %p3847_p8, %p3841_p5 }
  0x34   :  { %3851 = shalt.err (!%p3848_p9)
}
  0x35   :  { %55 = dma.hbm_to_vmem [thread:$0]  %s4486_s2, 256, %s50_s20, [#allocation7], %s3920_s25, %s3920_s25, %s3921_s26  }
  0x36   :  { %s3852_s17 = scalar_lea.hbm %s4487_s3, 256 }
  0x37   :  { %p3853_p10 = scmp.ne.s32.totalorder %s4487_s3, %s3852_s17  ;;  %p3856_p11 = scmp.lt.u32.totalorder %s3852_s17, %s4487_s3 }
  0x39   :  { %p3858_p12 = pnand %p3856_p11, %p3853_p10 }
  0x3b   :  { %3861 = shalt.err (!%p3858_p12)
}
  0x3c   :  { %s3862_s21 = scalar_lea.vmem %s4030_s22, 256  ;;  %p3867_p0 = scmp.lt.s32.totalorder %s4030_s22, %s4030_s22 }
  0x3d   :  { %p3863_p13 = scmp.ne.s32.totalorder %s4030_s22, %s3862_s21  ;;  %p3868_p1 = scmp.lt.s32.totalorder %s3862_s21, %s3862_s21 }
  0x3f   :  { %p3869_p2 = por %p3868_p1, %p3867_p0 }
  0x41   :  { %p3870_p3 = pnand %p3869_p2, %p3863_p13 }
  0x43   :  { %3873 = shalt.err (!%p3870_p3)
}
  0x44   :  { %67 = dma.hbm_to_vmem [thread:$0]  %s4487_s3, 256, %s4030_s22, [#allocation10], %s3920_s25, %s3920_s25, %s3921_s26  }
  0x45   :  { %s84_s27 = sshll.u32 %s4493_s9, 4  ;;  %s85_s27 = int_to_ptr.vmem [resolvable:$true] %s84_s27 }
  0x46   :  { %s3874_s28 = scalar_lea.vmem %s85_s27, 16  ;;  %p3879_p5 = scmp.lt.s32.totalorder %s85_s27, %s85_s27 }
  0x47   :  { %p3875_p4 = scmp.ne.s32.totalorder %s85_s27, %s3874_s28  ;;  %p3880_p6 = scmp.lt.s32.totalorder %s3874_s28, %s3874_s28 }
  0x49   :  { %p3881_p7 = por %p3880_p6, %p3879_p5 }
  0x4b   :  { %p3882_p8 = pnand %p3881_p7, %p3875_p4 }
  0x4d   :  { %3885 = shalt.err (!%p3882_p8)
}
  0x4e   :  { %s3924_s29 = smov [#allocation11]  }
  0x4f   :  { %87 = dma.vmem_to_smem %s85_s27, 16, %s3924_s29, [#allocation5]  }
  0x50   :  { %3908 = dma.done.wait [#allocation3], 256  }
  0x51   :  { %3909 = vsyncadd [#allocation3], 4294967040 }
  0x52   :  { %3910 = dma.done.wait [#allocation7], 512  }
  0x53   :  { %3911 = vsyncadd [#allocation7], 4294966784 }
  0x54   :  { %3912 = dma.done.wait [#allocation10], 256  }
  0x55   :  { %3913 = vsyncadd [#allocation10], 4294967040 }
  0x56   :  { %3914 = dma.done.wait [#allocation5], 16  }
  0x57   :  { %3915 = vsyncadd [#allocation5], 4294967280 }
  0x58   :  { %103 = sfence }
  0x59   :  { %v4070_v0 = vld [vmem:[#allocation2] sm:$0xff]  ;;  %vm110_vm0 = vcmask 261120   ;;  %v4072_v1 = vld [vmem:[#allocation2 + $0x8] sm:$0xff]  ;;  %v4095_v16 = vld [vmem:[%s4488_s4 + $0x10] sm:$0xff]  ;;  %s108_s13 = sld [smem:[#allocation11]]  ;;  %s3046_s15 = sld [smem:[#allocation11 + $0x3]] }
  0x5a   :  { %v111_v2 = vsel %vm110_vm0, %v4070_v0, 0.0  ;;  %v114_v3 = vsel %vm110_vm0, %v4072_v1, 0.0  ;;  %v4085_v14 = vld [vmem:[%s4488_s4] sm:$0xff]  ;;  %v4090_v15 = vld [vmem:[%s4488_s4 + $0x8] sm:$0xff]  ;;  %v4102_v18 = vld [vmem:[%s4488_s4 + $0x18] sm:$0xff]  ;;  %vm244_vm1 = vcmask 64512  }
  0x5b   :  { %112 = vadd.xlane.f32.xlu0 %v111_v2  ;;  %v3465_v17 = vpack.c.bf16 %v4090_v15, %v4085_v14  ;;  %v3469_v19 = vpack.c.bf16 %v4102_v18, %v4095_v16  ;;  %v4111_v36 = vld [vmem:[%s4492_s8] ss:$0 sm:$0xff]  ;;  %s3925_s18 = smov 88   ;;  %s3926_s1 = smov 96   ;;  %vm4141_vm2 = vmpackc.low %vm244_vm1, %vm244_vm1  ;;  %v4163_v60 = vld [vmem:[#allocation8 + $0x8] sm:$0xff]  ;;  %vm332_vm3 = vcmask 130048  }
  0x5c   :  { %s3927_s14 = smov 120   ;;  %s3928_s19 = smov 80   ;;  %v4165_v63 = vld [vmem:[#allocation8] sm:$0xff]  ;;  %vm2940_vm4 = vcmask 523264  }
  0x5d   :  { %3466 = vmatprep.subr.bf16.mxu1 %v3465_v17  ;;  %s3929_s21 = smov 112   ;;  %s3930_s2 = smov 64  }
  0x5e   :  { %3468 = vmatpush3.bf16.msra.mxu1 %v3465_v17  ;;  %s3931_s20 = smov 72   ;;  %s3932_s23 = smov 104  }
  0x5f   :  { %115 = vadd.xlane.f32.xlu0 %v114_v3  ;;  %3470 = vmatprep.subr.bf16.mxu1 %v3469_v19  ;;  %v132_v26 = vstv %s108_s13  ;;  %v141_v29 = vstv %s3046_s15  ;;  %s3933_s24 = smov 56   ;;  %s3934_s27 = smov 32  }
  0x60   :  { %s3935_s28 = smov 48   ;;  %s3936_s29 = smov 40  }
  0x61   :  { %s3082_s15 = sld [smem:[#allocation11 + $0x1]]  ;;  %s3083_s4 = sld [smem:[#allocation11 + $0x4]] }
  0x62   :  { %3472 = vmatpush3.bf16.msra.mxu1 %v3469_v19  ;;  %s3121_s12 = sld [smem:[#allocation11 + $0x2]] }
  0xe8   :  { %v113_v4 = vpop.xlane.xlu0 %112 }
  0xe9   :  { %v118_v5 = vmul.f32 0.03125, %v113_v4 }
  0xeb   :  { %v120_v6 = vsub.f32 %v4070_v0, %v118_v5 }
  0xec   :  { %v116_v7 = vpop.xlane.xlu0 %115 }
  0xed   :  { %v119_v8 = vmul.f32 0.03125, %v116_v7  ;;  %v122_v9 = vmul.f32 %v120_v6, %v120_v6  ;;  %v133_v27 = vmul.f32 %v132_v26, %v120_v6 }
  0xef   :  { %v121_v10 = vsub.f32 %v4072_v1, %v119_v8  ;;  %v124_v11 = vsel %vm110_vm0, %v122_v9, 0.0 }
  0xf0   :  { %125 = vadd.xlane.f32.xlu1 %v124_v11 }
  0xf1   :  { %v123_v12 = vmul.f32 %v121_v10, %v121_v10  ;;  %v134_v31 = vmul.f32 %v132_v26, %v121_v10 }
  0xf3   :  { %v127_v13 = vsel %vm110_vm0, %v123_v12, 0.0 }
  0xf4   :  { %128 = vadd.xlane.f32.xlu1 %v127_v13 }
 0x17d   :  { %v126_v20 = vpop.xlane.xlu1 %125 }
 0x17e   :  { %v130_v21 = vmul.f32 0.032258064, %v126_v20 }
 0x180   :  { %v135_v22 = vadd.f32 1e-06, %v130_v21 }
 0x181   :  { %v129_v23 = vpop.xlane.xlu1 %128 }
 0x182   :  { %3710 = vrsqrt.f32 %v135_v22  ;;  %v131_v24 = vmul.f32 0.032258064, %v129_v23 }
 0x184   :  { %v136_v25 = vadd.f32 1e-06, %v131_v24 }
 0x186   :  { %3712 = vrsqrt.f32 %v136_v25 }
 0x18c   :  { %v3711_v28 = vpop.eup %3710 }
 0x18d   :  { %v139_v30 = vmul.f32 %v3711_v28, %v133_v27 }
 0x18f   :  { %v142_v32 = vadd.f32 %v141_v29, %v139_v30 }
 0x190   :  { %v3713_v33 = vpop.eup %3712 }
 0x191   :  { %v140_v34 = vmul.f32 %v3713_v33, %v134_v31  ;;  %3258 = vmatprep.mubr.msk.f32.mxu1 %vm110_vm0, %v142_v32 }
 0x193   :  { %v143_v35 = vadd.f32 %v141_v29, %v140_v34 }
 0x195   :  { %3259 = vmatmul.mubr.msk.f32.vlgmr.msra.gmra.mrb[0].mxu1 %vm110_vm0, %v143_v35 }
 0x268   :  { %v3260_v37 = vpop.f32.mrb[0].mxu1 }
 0x269   :  { %v4114_v38 = vadd.f32 %v3260_v37, %v4111_v36  ;;  %v227_v39 = vpop.f32.mrb[1].mxu1 }
 0x26a   :  { %v4117_v40 = vadd.f32 %v4111_v36, %v227_v39 }
 0x26c   :  { %3265 = vmatprep.mubr.msk.f32.mxu1 %vm244_vm1, %v4117_v40  ;;  %v4123_v41 = vpack.i.bf16 %v4114_v38, %v4117_v40 }
 0x26e   :  { %3631 = vrot.lane.b32.xlu1 %v4123_v41, %s3925_s18  ;;  %3626 = vrot.lane.b32.xlu0 %v4123_v41, %s3926_s1 }
 0x272   :  { %443 = vrot.lane.b32.xlu1 %v4117_v40, %s3927_s14  ;;  %3636 = vrot.lane.b32.xlu0 %v4123_v41, %s3928_s19 }
 0x276   :  { %445 = vrot.lane.b32.xlu1 %v4114_v38, %s3927_s14  ;;  %820 = vrot.lane.b32.xlu0 %v4114_v38, %s3929_s21 }
 0x27a   :  { %818 = vrot.lane.b32.xlu1 %v4117_v40, %s3929_s21 }
 0x2e0   :  { %v3632_v42 = vpop.permute.xlu1 %3631  ;;  %v3627_v43 = vpop.permute.xlu0 %3626 }
 0x2e1   :  { %v3634_v44 = vunpack.i.h.bf16 %v3632_v42  ;;  %v3633_v45 = vunpack.i.l.bf16 %v3632_v42  ;;  %v3629_v46 = vunpack.i.h.bf16 %v3627_v43  ;;  %v3628_v47 = vunpack.i.l.bf16 %v3627_v43 }
 0x2e3   :  { %v3473_v49 = vpack.c.bf16 %v3629_v46, %v3628_v47  ;;  %v3483_v50 = vpack.c.bf16 %v3634_v44, %v3633_v45 }
 0x2e4   :  { %v3637_v51 = vpop.permute.xlu0 %3636  ;;  %v444_v52 = vpop.permute.xlu1 %443 }
 0x2e5   :  { %3475 = vmatprep.subr.msk.bf16.mxu1 %vm4141_vm2, %v3473_v49  ;;  %v3639_v53 = vunpack.i.h.bf16 %v3637_v51  ;;  %v3638_v54 = vunpack.i.l.bf16 %v3637_v51 }
 0x2e6   :  { %3478 = vmatpush3.bf16.xpose.msk.msra.mxu1 %vm4141_vm2, %v3473_v49 }
 0x2e7   :  { %3485 = vmatprep.subr.msk.bf16.mxu1 %vm4141_vm2, %v3483_v50  ;;  %v3493_v55 = vpack.c.bf16 %v3639_v53, %v3638_v54 }
 0x2e8   :  { %v446_v56 = vpop.permute.xlu1 %445  ;;  %v821_v58 = vpop.permute.xlu0 %820 }
 0x2ec   :  { %v819_v57 = vpop.permute.xlu1 %818 }
 0x2ed   :  { %3266 = vmatmul.mubr.msk.f32.vlgmr.msra.gmra.mrb[2].mxu1 %vm244_vm1, %v4114_v38 }
 0x2ee   :  { %3488 = vmatpush3.bf16.xpose.msk.msra.mxu1 %vm4141_vm2, %v3483_v50  ;;  %3279 = vmatprep.mubr.msk.f32.mxu1 %vm244_vm1, %v444_v52 }
 0x2ef   :  { %3495 = vmatprep.subr.msk.bf16.mxu1 %vm4141_vm2, %v3493_v55 }
 0x2f5   :  { %3280 = vmatmul.mubr.msk.f32.vlgmr.msra.gmra.mrb[4].mxu1 %vm244_vm1, %v446_v56 }
 0x2f6   :  { %3498 = vmatpush3.bf16.xpose.msk.msra.mxu1 %vm4141_vm2, %v3493_v55  ;;  %3303 = vmatprep.mubr.msk.f32.mxu1 %vm244_vm1, %v819_v57 }
 0x2fd   :  { %3304 = vmatmul.mubr.msk.f32.vlgmr.msra.gmra.mrb[6].mxu1 %vm244_vm1, %v821_v58 }
 0x3c0   :  { %v3267_v59 = vpop.f32.mrb[2].mxu1 }
 0x3c1   :  { %v329_v61 = vmul.f32 0.35355338, %v3267_v59  ;;  %v319_v62 = vpop.f32.mrb[3].mxu1 }
 0x3c2   :  { %v328_v2 = vmul.f32 0.35355338, %v319_v62 }
 0x3c3   :  { %v331_v3 = vadd.f32 %v329_v61, %v4163_v60 }
 0x3c4   :  { %v330_v4 = vadd.f32 %v328_v2, %v4165_v63 }
 0x3c5   :  { %v336_v5 = vsel %vm332_vm3, %v331_v3, -inf }
 0x3c6   :  { %337 = vmax.xlane.f32.xlu0 %v336_v5  ;;  %v333_v6 = vsel %vm332_vm3, %v330_v4, -inf }
 0x3c7   :  { %334 = vmax.xlane.f32.xlu1 %v333_v6 }
 0x3c8   :  { %v3281_v7 = vpop.f32.mrb[4].mxu1 }
 0x3c9   :  { %v535_v8 = vmul.f32 0.35355338, %v3281_v7  ;;  %v525_v9 = vpop.f32.mrb[5].mxu1 }
 0x3ca   :  { %v534_v10 = vmul.f32 0.35355338, %v525_v9 }
 0x3cb   :  { %v537_v11 = vadd.f32 %v535_v8, %v4163_v60 }
 0x3cc   :  { %v536_v13 = vadd.f32 %v534_v10, %v4165_v63 }
 0x3cd   :  { %v541_v12 = vsel %vm332_vm3, %v537_v11, -inf }
 0x3ce   :  { %542 = vmax.xlane.f32.xlu0 %v541_v12  ;;  %v538_v20 = vsel %vm332_vm3, %v536_v13, -inf }
 0x3d0   :  { %v3305_v17 = vpop.f32.mrb[6].mxu1 }
 0x3d1   :  { %v900_v19 = vpop.f32.mrb[7].mxu1  ;;  %v910_v22 = vmul.f32 0.35355338, %v3305_v17 }
 0x3d2   :  { %539 = vmax.xlane.f32.xlu0 %v538_v20  ;;  %v909_v21 = vmul.f32 0.35355338, %v900_v19 }
 0x3d3   :  { %v4188_v24 = vadd.f32 %v910_v22, %v4163_v60 }
 0x3d4   :  { %v4185_v23 = vadd.f32 %v909_v21, %v4165_v63 }
 0x3d5   :  { %v916_v26 = vsel %vm332_vm3, %v4188_v24, -inf }
 0x3d6   :  { %v913_v25 = vsel %vm332_vm3, %v4185_v23, -inf }
 0x3d8   :  { %3641 = vrot.lane.b32.xlu1 %v4123_v41, %s3930_s2 }
 0x3dc   :  { %3651 = vrot.lane.b32.xlu1 %v4123_v41, %s3931_s20 }
 0x3e0   :  { %1110 = vrot.lane.b32.xlu1 %v4117_v40, %s3932_s23 }
 0x3e4   :  { %1112 = vrot.lane.b32.xlu1 %v4114_v38, %s3932_s23 }
 0x3e8   :  { %3646 = vrot.lane.b32.xlu0 %v4123_v41, %s3933_s24 }
 0x407   :  { %914 = vmax.xlane.f32.xlu0 %v913_v25 }
 0x408   :  { %917 = vmax.xlane.f32.xlu1 %v916_v26 }
 0x453   :  { %v338_v27 = vpop.xlane.xlu0 %337 }
 0x454   :  { %v340_v28 = vsub.f32 %v331_v3, %v338_v27  ;;  %v335_v29 = vpop.xlane.xlu1 %334 }
 0x455   :  { %v339_v30 = vsub.f32 %v330_v4, %v335_v29 }
 0x456   :  { %v343_v31 = vmul.f32 1.442695, %v340_v28 }
 0x457   :  { %v341_v32 = vmul.f32 1.442695, %v339_v30 }
 0x458   :  { %3714 = vpow2.f32 %v343_v31  ;;  %v3642_v33 = vpop.permute.xlu1 %3641 }
 0x459   :  { %3716 = vpow2.f32 %v341_v32  ;;  %v3644_v34 = vunpack.i.h.bf16 %v3642_v33  ;;  %v3643_v35 = vunpack.i.l.bf16 %v3642_v33 }
 0x45b   :  { %v543_v37 = vpop.xlane.xlu0 %542  ;;  %v3479_v38 = vpack.c.bf16 %v3644_v34, %v3643_v35 }
 0x45c   :  { %v545_v39 = vsub.f32 %v537_v11, %v543_v37  ;;  %v3652_v40 = vpop.permute.xlu1 %3651 }
 0x45d   :  { %v3654_v42 = vunpack.i.h.bf16 %v3652_v40  ;;  %v3653_v43 = vunpack.i.l.bf16 %v3652_v40  ;;  %3480 = vmatprep.subr.bf16.mxu0 %v3479_v38 }
 0x45e   :  { %v548_v44 = vmul.f32 1.442695, %v545_v39  ;;  %3482 = vmatpush3.bf16.msra.mxu0 %v3479_v38 }
 0x45f   :  { %v3503_v45 = vpack.c.bf16 %v3654_v42, %v3653_v43  ;;  %v540_v46 = vpop.xlane.xlu0 %539 }
 0x460   :  { %3718 = vpow2.f32 %v548_v44  ;;  %v544_v47 = vsub.f32 %v536_v13, %v540_v46  ;;  %v1111_v49 = vpop.permute.xlu1 %1110 }
 0x461   :  { %3505 = vmatprep.subr.msk.bf16.mxu1 %vm4141_vm2, %v3503_v45  ;;  %3322 = vmatprep.mubr.msk.f32.mxu1 %vm244_vm1, %v1111_v49 }
 0x462   :  { %v3715_v50 = vpop.eup %3714  ;;  %v546_v51 = vmul.f32 1.442695, %v544_v47  ;;  %3508 = vmatpush3.bf16.xpose.msk.msra.mxu1 %vm4141_vm2, %v3503_v45 }
 0x463   :  { %v3717_v52 = vpop.eup %3716  ;;  %v3647_v53 = vpop.permute.xlu0 %3646  ;;  %v348_v54 = vsel %vm332_vm3, %v3715_v50, 0.0 }
 0x464   :  { %3720 = vpow2.f32 %v546_v51  ;;  %v3649_v55 = vunpack.i.h.bf16 %v3647_v53  ;;  %v3648_v56 = vunpack.i.l.bf16 %v3647_v53  ;;  %349 = vadd.xlane.f32.xlu0 %v348_v54  ;;  %3272 = vmatprep.mubr.msk.f32.mxu0 %vm332_vm3, %v3717_v52  ;;  %v345_v58 = vsel %vm332_vm3, %v3717_v52, 0.0  ;;  %v1113_v59 = vpop.permute.xlu1 %1112 }
 0x465   :  { %3273 = vmatmul.mubr.msk.f32.vlgmr.msra.gmra.mrb[0].mxu0 %vm332_vm3, %v3715_v50 }
 0x466   :  { %v3489_v57 = vpack.c.bf16 %v3649_v55, %v3648_v56 }
 0x468   :  { %346 = vadd.xlane.f32.xlu0 %v345_v58  ;;  %3490 = vmatprep.subr.bf16.mxu0 %v3489_v57 }
 0x469   :  { %3492 = vmatpush3.bf16.msra.mxu0 %v3489_v57  ;;  %3323 = vmatmul.mubr.msk.f32.vlgmr.msra.gmra.mrb[8].mxu1 %vm244_vm1, %v1113_v59 }
 0x46a   :  { %v3719_v61 = vpop.eup %3718 }
 0x46b   :  { %v553_v62 = vsel %vm332_vm3, %v3719_v61, 0.0 }
 0x46c   :  { %554 = vadd.xlane.f32.xlu1 %v553_v62 }
 0x46e   :  { %v3721_v2 = vpop.eup %3720 }
 0x46f   :  { %3286 = vmatprep.mubr.msk.f32.mxu0 %vm332_vm3, %v3721_v2  ;;  %v550_v3 = vsel %vm332_vm3, %v3721_v2, 0.0 }
 0x470   :  { %551 = vadd.xlane.f32.xlu0 %v550_v3  ;;  %3287 = vmatmul.mubr.msk.f32.vlgmr.msra.gmra.mrb[2].mxu0 %vm332_vm3, %v3719_v61 }
 0x47d   :  { %734 = vrot.lane.b32.xlu1 %v4085_v14, %s3934_s27 }
 0x481   :  { %3656 = vrot.lane.b32.xlu1 %v4123_v41, %s3935_s28 }
 0x486   :  { %649 = vrot.lane.b32.xlu0 %v4090_v15, %s3934_s27 }
 0x494   :  { %v915_v4 = vpop.xlane.xlu0 %914 }
 0x495   :  { %v919_v5 = vsub.f32 %v4185_v23, %v915_v4  ;;  %v918_v14 = vpop.xlane.xlu1 %917 }
 0x496   :  { %v920_v17 = vsub.f32 %v4188_v24, %v918_v14 }
 0x497   :  { %v921_v6 = vmul.f32 1.442695, %v919_v5 }
 0x498   :  { %v923_v22 = vmul.f32 1.442695, %v920_v17 }
 0x499   :  { %3722 = vpow2.f32 %v921_v6 }
 0x4a3   :  { %v3723_v7 = vpop.eup %3722 }
 0x4a4   :  { %v925_v8 = vsel %vm332_vm3, %v3723_v7, 0.0 }
 0x4a5   :  { %926 = vadd.xlane.f32.xlu1 %v925_v8 }
 0x4b6   :  { %1024 = vrot.lane.b32.xlu1 %v4095_v16, %s3934_s27 }
 0x4f1   :  { %v350_v9 = vpop.xlane.xlu0 %349 }
 0x4f2   :  { %3724 = vrcp.f32 %v350_v9 }
 0x4f5   :  { %v347_v10 = vpop.xlane.xlu0 %346 }
 0x4f6   :  { %3726 = vrcp.f32 %v347_v10 }
 0x4f9   :  { %v555_v11 = vpop.xlane.xlu1 %554 }
 0x4fc   :  { %v3725_v19 = vpop.eup %3724 }
 0x4fd   :  { %v552_v12 = vpop.xlane.xlu0 %551  ;;  %v735_v15 = vpop.permute.xlu1 %734 }
 0x4fe   :  { %3728 = vrcp.f32 %v552_v12 }
 0x4ff   :  { %3730 = vrcp.f32 %v555_v11 }
 0x500   :  { %v3727_v21 = vpop.eup %3726  ;;  %3732 = vpow2.f32 %v923_v22 }
 0x501   :  { %v650_v13 = vpop.permute.xlu0 %649  ;;  %v3657_v31 = vpop.permute.xlu1 %3656 }
 0x502   :  { %3289 = vmatprep.subr.mxu0 %v650_v13  ;;  %v3659_v35 = vunpack.i.h.bf16 %v3657_v31  ;;  %v3658_v37 = vunpack.i.l.bf16 %v3657_v31 }
 0x503   :  { %3290 = vmatpush3.msra.mxu0 %v650_v13 }
 0x504   :  { %3294 = vmatprep.subr.mxu0 %v735_v15 }
 0x508   :  { %v3729_v34 = vpop.eup %3728 }
 0x509   :  { %v3731_v39 = vpop.eup %3730 }
 0x50a   :  { %v3733_v44 = vpop.eup %3732 }
 0x532   :  { %v927_v45 = vpop.xlane.xlu1 %926 }
 0x536   :  { %v1025_v46 = vpop.permute.xlu1 %1024 }
 0x538   :  { %v3274_v20 = vpop.f32.mrb[0].mxu0 }
 0x539   :  { %v441_v23 = vmul.f32 %v3725_v19, %v3274_v20  ;;  %v431_v16 = vpop.f32.mrb[1].mxu0 }
 0x53a   :  { %v440_v25 = vmul.f32 %v3727_v21, %v431_v16 }
 0x53c   :  { %v3324_v26 = vpop.f32.mrb[8].mxu1 }
 0x53d   :  { %v1192_v27 = vpop.f32.mrb[9].mxu1  ;;  %v1202_v28 = vmul.f32 0.35355338, %v3324_v26 }
 0x53e   :  { %v1201_v29 = vmul.f32 0.35355338, %v1192_v27 }
 0x53f   :  { %v1204_v24 = vadd.f32 %v1202_v28, %v4163_v60  ;;  %v928_v60 = vsel %vm332_vm3, %v3733_v44, 0.0 }
 0x540   :  { %v1203_v30 = vadd.f32 %v1201_v29, %v4165_v63  ;;  %v3499_v63 = vpack.c.bf16 %v3659_v35, %v3658_v37  ;;  %v4271_v37 = vld [vmem:[%s4489_s5 + $0x10] sm:$0xff] }
 0x541   :  { %v1208_v43 = vsel %vm332_vm3, %v1204_v24, -inf }
 0x542   :  { %v1205_v32 = vsel %vm332_vm3, %v1203_v30, -inf }
 0x543   :  { %1206 = vmax.xlane.f32.xlu0 %v1205_v32  ;;  %v3288_v33 = vpop.f32.mrb[2].mxu0 }
 0x544   :  { %v636_v38 = vpop.f32.mrb[3].mxu0  ;;  %v646_v42 = vmul.f32 %v3731_v39, %v3288_v33  ;;  %v4259_v33 = vld [vmem:[%s4489_s5] sm:$0xff] }
 0x545   :  { %v645_v40 = vmul.f32 %v3729_v34, %v636_v38  ;;  %v4264_v34 = vld [vmem:[%s4489_s5 + $0x8] sm:$0xff]  ;;  %v4276_v38 = vld [vmem:[%s4489_s5 + $0x18] sm:$0xff]  ;;  %s3122_s5 = sld [smem:[#allocation11 + $0x5]] }
 0x546   :  { %v3665_v35 = vpack.i.bf16 %v4264_v34, %v4259_v33  ;;  %v3670_v39 = vpack.i.bf16 %v4276_v38, %v4271_v37 }
 0x547   :  { %1209 = vmax.xlane.f32.xlu0 %v1208_v43  ;;  %3291 = vmatprep.mubr.msk.f32.mxu0 %vm244_vm1, %v645_v40  ;;  %v3513_v40 = vpack.c.bf16 %v4264_v34, %v4259_v33  ;;  %v3517_v43 = vpack.c.bf16 %v4276_v38, %v4271_v37 }
 0x548   :  { %3292 = vmatmul.mubr.msk.f32.vlgmr.msra.gmra.mrb[4].mxu0 %vm244_vm1, %v646_v42  ;;  %v106_v42 = vld [vmem:[#allocation6] sm:$0xff] }
 0x549   :  { %3295 = vmatpush3.msra.mxu0 %v735_v15  ;;  %3296 = vmatprep.mubr.msk.f32.mxu0 %vm244_vm1, %v440_v25 }
 0x54a   :  { %3500 = vmatprep.subr.bf16.mxu0 %v3499_v63  ;;  %3514 = vmatprep.subr.bf16.mxu1 %v3513_v40 }
 0x54b   :  { %929 = vadd.xlane.f32.xlu0 %v928_v60  ;;  %3516 = vmatpush3.bf16.msra.mxu1 %v3513_v40 }
 0x54c   :  { %3518 = vmatprep.subr.bf16.mxu1 %v3517_v43 }
 0x54f   :  { %3520 = vmatpush3.bf16.msra.mxu1 %v3517_v43 }
 0x550   :  { %3297 = vmatmul.mubr.msk.f32.vlgmr.msra.gmra.mrb[4].mxu0 %vm244_vm1, %v441_v23 }
 0x551   :  { %3502 = vmatpush3.bf16.msra.mxu0 %v3499_v63  ;;  %3310 = vmatprep.mubr.msk.f32.mxu0 %vm332_vm3, %v3723_v7 }
 0x552   :  { %3313 = vmatprep.subr.mxu0 %v1025_v46 }
 0x554   :  { %3311 = vmatmul.mubr.msk.f32.vlgmr.msra.gmra.mrb[6].mxu0 %vm332_vm3, %v3733_v44  ;;  %v4290_v44 = vld [vmem:[%s4492_s8 + $0x1] ss:$0 sm:$0xff] }
 0x555   :  { %3314 = vmatpush3.msra.mxu0 %v1025_v46 }
 0x561   :  { %3661 = vrot.lane.b32.xlu0 %v4123_v41, %s3936_s29 }
 0x5d0   :  { %v1207_v47 = vpop.xlane.xlu0 %1206 }
 0x5d1   :  { %v1211_v49 = vsub.f32 %v1203_v30, %v1207_v47 }
 0x5d3   :  { %v1213_v50 = vmul.f32 1.442695, %v1211_v49 }
 0x5d4   :  { %v1210_v51 = vpop.xlane.xlu0 %1209 }
 0x5d5   :  { %3734 = vpow2.f32 %v1213_v50  ;;  %v1212_v52 = vsub.f32 %v1204_v24, %v1210_v51 }
 0x5d7   :  { %v1215_v53 = vmul.f32 1.442695, %v1212_v52 }
 0x5d8   :  { %v930_v54 = vpop.xlane.xlu0 %929 }
 0x5d9   :  { %3736 = vpow2.f32 %v1215_v53 }
 0x5da   :  { %3738 = vrcp.f32 %v930_v54 }
 0x5db   :  { %3740 = vrcp.f32 %v927_v45 }
 0x5dc   :  { %v3662_v55 = vpop.permute.xlu0 %3661 }
 0x5dd   :  { %v3664_v56 = vunpack.i.h.bf16 %v3662_v55  ;;  %v3663_v57 = vunpack.i.l.bf16 %v3662_v55 }
 0x5df   :  { %v3735_v58 = vpop.eup %3734  ;;  %v3509_v59 = vpack.c.bf16 %v3664_v56, %v3663_v57 }
 0x5e0   :  { %v1217_v61 = vsel %vm332_vm3, %v3735_v58, 0.0 }
 0x5e1   :  { %1218 = vadd.xlane.f32.xlu1 %v1217_v61  ;;  %3510 = vmatprep.subr.bf16.mxu0 %v3509_v59 }
 0x5e3   :  { %v3737_v41 = vpop.eup %3736 }
 0x5e4   :  { %v1220_v62 = vsel %vm332_vm3, %v3737_v41, 0.0  ;;  %v3739_v2 = vpop.eup %3738 }
 0x5e5   :  { %1221 = vadd.xlane.f32.xlu0 %v1220_v62  ;;  %v3741_v4 = vpop.eup %3740  ;;  %v107_v62 = vld [vmem:[#allocation6 + $0x8] sm:$0xff] }
 0x5f2   :  { %1315 = vrot.lane.b32.xlu1 %v4102_v18, %s3934_s27 }
 0x5fb   :  { %1401 = vrot.lane.b32.xlu0 %v4111_v36, %s3934_s27 }
 0x627   :  { %v3312_v3 = vpop.f32.mrb[6].mxu0 }
 0x628   :  { %v1021_v5 = vmul.f32 %v3739_v2, %v3312_v3  ;;  %v1011_v6 = vpop.f32.mrb[7].mxu0 }
 0x629   :  { %v1020_v7 = vmul.f32 %v3741_v4, %v1011_v6  ;;  %v1439_v4 = vstv %s3083_s4 }
 0x62b   :  { %3315 = vmatprep.mubr.msk.f32.mxu0 %vm244_vm1, %v1020_v7 }
 0x62c   :  { %3316 = vmatmul.mubr.msk.f32.vlgmr.msra.gmra.mrb[4].mxu0 %vm244_vm1, %v1021_v5 }
 0x62d   :  { %3512 = vmatpush3.bf16.msra.mxu0 %v3509_v59  ;;  %3329 = vmatprep.mubr.msk.f32.mxu0 %vm332_vm3, %v3735_v58  ;;  %v1430_v58 = vstv %s3082_s15 }
 0x630   :  { %3330 = vmatmul.mubr.msk.f32.vlgmr.msra.gmra.mrb[8].mxu0 %vm332_vm3, %v3737_v41 }
 0x66e   :  { %v1219_v18 = vpop.xlane.xlu1 %1218 }
 0x66f   :  { %3742 = vrcp.f32 %v1219_v18 }
 0x672   :  { %v1316_v8 = vpop.permute.xlu1 %1315  ;;  %v1222_v36 = vpop.xlane.xlu0 %1221 }
 0x673   :  { %3332 = vmatprep.subr.mxu0 %v1316_v8  ;;  %3744 = vrcp.f32 %v1222_v36 }
 0x674   :  { %3333 = vmatpush3.msra.mxu0 %v1316_v8 }
 0x676   :  { %v1402_v15 = vpop.permute.xlu0 %1401 }
 0x679   :  { %v3743_v14 = vpop.eup %3742 }
 0x67d   :  { %v3745_v11 = vpop.eup %3744 }
 0x703   :  { %v3331_v9 = vpop.f32.mrb[8].mxu0 }
 0x704   :  { %v1303_v10 = vpop.f32.mrb[9].mxu0  ;;  %v1313_v13 = vmul.f32 %v3745_v11, %v3331_v9 }
 0x705   :  { %v1312_v12 = vmul.f32 %v3743_v14, %v1303_v10 }
 0x707   :  { %3334 = vmatprep.mubr.msk.f32.mxu0 %vm244_vm1, %v1312_v12 }
 0x708   :  { %3335 = vmatmul.mubr.msk.f32.vlgmr.msra.gmra.mrb[4].mxu0 %vm244_vm1, %v1313_v13 }
 0x709   :  { %3356 = vmatprep.mubr.msk.f32.mxu0 %vm110_vm0, %v106_v42 }
 0x7db   :  { %v3336_v17 = vpop.f32.mrb[4].mxu0 }
 0x7dc   :  { %v1405_v19 = vadd.f32 %v3336_v17, %v1402_v15  ;;  %v1390_v20 = vpop.f32.mrb[5].mxu0 }
 0x7dd   :  { %v1404_v21 = vadd.f32 %v1402_v15, %v1390_v20 }
 0x7de   :  { %v4243_v22 = vadd.f32 %v1405_v19, %v4072_v1 }
 0x7df   :  { %v4246_v23 = vadd.f32 %v1404_v21, %v4070_v0 }
 0x7e0   :  { %v1413_v16 = vsel %vm110_vm0, %v4243_v22, 0.0 }
 0x7e1   :  { %1414 = vadd.xlane.f32.xlu0 %v1413_v16  ;;  %v1410_v25 = vsel %vm110_vm0, %v4246_v23, 0.0 }
 0x7e2   :  { %1411 = vadd.xlane.f32.xlu1 %v1410_v25 }
 0x86e   :  { %v1415_v26 = vpop.xlane.xlu0 %1414 }
 0x86f   :  { %v1417_v27 = vmul.f32 0.03125, %v1415_v26  ;;  %v1412_v28 = vpop.xlane.xlu1 %1411 }
 0x870   :  { %v1416_v29 = vmul.f32 0.03125, %v1412_v28 }
 0x871   :  { %v1419_v30 = vsub.f32 %v4243_v22, %v1417_v27 }
 0x872   :  { %v1418_v1 = vsub.f32 %v4246_v23, %v1416_v29 }
 0x873   :  { %v1421_v31 = vmul.f32 %v1419_v30, %v1419_v30  ;;  %v1432_v59 = vmul.f32 %v1430_v58, %v1419_v30 }
 0x874   :  { %v1420_v32 = vmul.f32 %v1418_v1, %v1418_v1  ;;  %v1431_v41 = vmul.f32 %v1430_v58, %v1418_v1 }
 0x875   :  { %v1425_v0 = vsel %vm110_vm0, %v1421_v31, 0.0 }
 0x876   :  { %1426 = vadd.xlane.f32.xlu0 %v1425_v0  ;;  %v1422_v24 = vsel %vm110_vm0, %v1420_v32, 0.0  ;;  %v4332_v0 = vld [vmem:[#allocation9 + $0x8] sm:$0xff] }
 0x877   :  { %1423 = vadd.xlane.f32.xlu1 %v1422_v24 }
 0x888   :  { %3666 = vrot.lane.b32.xlu1 %v3665_v35, %s3926_s1 }
 0x88c   :  { %3671 = vrot.lane.b32.xlu0 %v3670_v39, %s3926_s1  ;;  %1550 = vrot.lane.b32.xlu1 %v4290_v44, %s3926_s1  ;;  %v4334_v39 = vld [vmem:[#allocation9] sm:$0xff] }
 0x903   :  { %v1427_v63 = vpop.xlane.xlu0 %1426 }
 0x904   :  { %v1429_v60 = vmul.f32 0.032258064, %v1427_v63  ;;  %v1424_v45 = vpop.xlane.xlu1 %1423 }
 0x905   :  { %v1428_v46 = vmul.f32 0.032258064, %v1424_v45 }
 0x906   :  { %v1434_v47 = vadd.f32 1e-06, %v1429_v60 }
 0x907   :  { %v1433_v49 = vadd.f32 1e-06, %v1428_v46  ;;  %v3672_v50 = vpop.permute.xlu0 %3671 }
 0x908   :  { %3746 = vrsqrt.f32 %v1434_v47  ;;  %v3667_v51 = vpop.permute.xlu1 %3666  ;;  %v3674_v52 = vunpack.i.h.bf16 %v3672_v50  ;;  %v3673_v53 = vunpack.i.l.bf16 %v3672_v50 }
 0x909   :  { %3748 = vrsqrt.f32 %v1433_v49  ;;  %v3669_v54 = vunpack.i.h.bf16 %v3667_v51  ;;  %v3668_v55 = vunpack.i.l.bf16 %v3667_v51 }
 0x90a   :  { %v3525_v57 = vpack.c.bf16 %v3674_v52, %v3673_v53 }
 0x90b   :  { %v3521_v56 = vpack.c.bf16 %v3669_v54, %v3668_v55 }
 0x90c   :  { %v1551_v18 = vpop.permute.xlu1 %1550 }
 0x90d   :  { %3522 = vmatprep.subr.bf16.mxu0 %v3521_v56 }
 0x90e   :  { %3524 = vmatpush3.bf16.msra.mxu0 %v3521_v56 }
 0x90f   :  { %3526 = vmatprep.subr.bf16.mxu0 %v3525_v57 }
 0x912   :  { %v3747_v61 = vpop.eup %3746  ;;  %3528 = vmatpush3.bf16.msra.mxu0 %v3525_v57 }
 0x913   :  { %v3749_v2 = vpop.eup %3748  ;;  %v1438_v3 = vmul.f32 %v3747_v61, %v1432_v59 }
 0x914   :  { %v1437_v5 = vmul.f32 %v3749_v2, %v1431_v41 }
 0x915   :  { %3357 = vmatmul.mubr.msk.f32.vlgmr.msra.gmra.mrb[10].mxu0 %vm110_vm0, %v107_v62  ;;  %v1441_v7 = vadd.f32 %v1439_v4, %v1438_v3 }
 0x916   :  { %v1440_v6 = vadd.f32 %v1439_v4, %v1437_v5 }
 0x918   :  { %3345 = vmatprep.mubr.msk.f32.mxu1 %vm110_vm0, %v1440_v6 }
 0x919   :  { %3346 = vmatmul.mubr.msk.f32.vlgmr.msra.gmra.mrb[10].mxu1 %vm110_vm0, %v1441_v7 }
 0x9e8   :  { %v3358_v8 = vpop.f32.mrb[10].mxu0 }
 0x9e9   :  { %v1631_v36 = vadd.f32 %v3358_v8, %v1551_v18  ;;  %v1625_v9 = vpop.f32.mrb[11].mxu0 }
 0x9ea   :  { %v1626_v14 = vadd.f32 %v1625_v9, %v1551_v18 }
 0x9ec   :  { %v3347_v10 = vpop.f32.mrb[10].mxu1  ;;  %v4297_v11 = vpack.i.bf16 %v1631_v36, %v1626_v14  ;;  %v3529_v12 = vpack.c.bf16 %v1631_v36, %v1626_v14 }
 0x9ed   :  { %v4300_v13 = vadd.f32 %v3347_v10, %v4290_v44  ;;  %v1525_v15 = vpop.f32.mrb[11].mxu1 }
 0x9ee   :  { %v1526_v17 = vadd.f32 %v4290_v44, %v1525_v15  ;;  %3676 = vrot.lane.b32.xlu1 %v4297_v11, %s3927_s14  ;;  %3531 = vmatprep.subr.msk.bf16.mxu1 %vm4141_vm2, %v3529_v12 }
 0x9ef   :  { %1839 = vrot.lane.b32.xlu0 %v4300_v13, %s3927_s14  ;;  %3534 = vmatpush3.bf16.xpose.msk.msra.mxu1 %vm4141_vm2, %v3529_v12 }
 0x9f0   :  { %3363 = vmatprep.mubr.msk.f32.mxu1 %vm244_vm1, %v1526_v17 }
 0x9f2   :  { %1837 = vrot.lane.b32.xlu1 %v1526_v17, %s3927_s14 }
 0x9f3   :  { %2212 = vrot.lane.b32.xlu0 %v1526_v17, %s3929_s21 }
 0x9f6   :  { %3681 = vrot.lane.b32.xlu1 %v4297_v11, %s3929_s21  ;;  %3364 = vmatmul.mubr.msk.f32.vlgmr.msra.gmra.mrb[12].mxu1 %vm244_vm1, %v4300_v13 }
 0x9fa   :  { %2214 = vrot.lane.b32.xlu1 %v4300_v13, %s3929_s21 }
 0xa60   :  { %v3677_v19 = vpop.permute.xlu1 %3676 }
 0xa61   :  { %v3679_v20 = vunpack.i.h.bf16 %v3677_v19  ;;  %v3678_v21 = vunpack.i.l.bf16 %v3677_v19  ;;  %v1840_v26 = vpop.permute.xlu0 %1839 }
 0xa63   :  { %v3539_v16 = vpack.c.bf16 %v3679_v20, %v3678_v21 }
 0xa64   :  { %v1838_v25 = vpop.permute.xlu1 %1837 }
 0xa65   :  { %3541 = vmatprep.subr.msk.bf16.mxu1 %vm4141_vm2, %v3539_v16  ;;  %3377 = vmatprep.mubr.msk.f32.mxu1 %vm244_vm1, %v1838_v25  ;;  %v2213_v1 = vpop.permute.xlu0 %2212 }
 0xa66   :  { %3544 = vmatpush3.bf16.xpose.msk.msra.mxu1 %vm4141_vm2, %v3539_v16 }
 0xa68   :  { %v3682_v27 = vpop.permute.xlu1 %3681 }
 0xa69   :  { %v3684_v28 = vunpack.i.h.bf16 %v3682_v27  ;;  %v3683_v29 = vunpack.i.l.bf16 %v3682_v27 }
 0xa6b   :  { %v3549_v30 = vpack.c.bf16 %v3684_v28, %v3683_v29 }
 0xa6c   :  { %v2215_v31 = vpop.permute.xlu1 %2214 }
 0xa6d   :  { %3378 = vmatmul.mubr.msk.f32.vlgmr.msra.gmra.mrb[14].mxu1 %vm244_vm1, %v1840_v26  ;;  %3551 = vmatprep.subr.msk.bf16.mxu1 %vm4141_vm2, %v3549_v30 }
 0xa6e   :  { %3554 = vmatpush3.bf16.xpose.msk.msra.mxu1 %vm4141_vm2, %v3549_v30  ;;  %3401 = vmatprep.mubr.msk.f32.mxu1 %vm244_vm1, %v2213_v1 }
 0xa75   :  { %3402 = vmatmul.mubr.msk.f32.vlgmr.msra.gmra.mrb[16].mxu1 %vm244_vm1, %v2215_v31 }
 0xac9   :  { %v3365_v32 = vpop.f32.mrb[12].mxu1 }
 0xaca   :  { %v1724_v24 = vmul.f32 0.35355338, %v3365_v32  ;;  %v1714_v35 = vpop.f32.mrb[13].mxu1 }
 0xacb   :  { %v1723_v40 = vmul.f32 0.35355338, %v1714_v35 }
 0xacc   :  { %v1726_v42 = vadd.f32 %v1724_v24, %v4332_v0 }
 0xacd   :  { %v1725_v43 = vadd.f32 %v1723_v40, %v4334_v39 }
 0xace   :  { %v1730_v63 = vsel %vm332_vm3, %v1726_v42, -inf }
 0xacf   :  { %1731 = vmax.xlane.f32.xlu1 %v1730_v63  ;;  %v1727_v60 = vsel %vm332_vm3, %v1725_v43, -inf }
 0xad0   :  { %1728 = vmax.xlane.f32.xlu0 %v1727_v60 }
 0xae0   :  { %3691 = vrot.lane.b32.xlu1 %v4297_v11, %s3925_s18 }
 0xae4   :  { %3696 = vrot.lane.b32.xlu1 %v4297_v11, %s3932_s23 }
 0xae8   :  { %2504 = vrot.lane.b32.xlu1 %v1526_v17, %s3932_s23 }
 0xb40   :  { %v3379_v45 = vpop.f32.mrb[14].mxu1 }
 0xb41   :  { %v1929_v46 = vmul.f32 0.35355338, %v3379_v45  ;;  %v1919_v47 = vpop.f32.mrb[15].mxu1 }
 0xb42   :  { %v1928_v49 = vmul.f32 0.35355338, %v1919_v47 }
 0xb43   :  { %v1931_v50 = vadd.f32 %v1929_v46, %v4332_v0 }
 0xb44   :  { %v1930_v52 = vadd.f32 %v1928_v49, %v4334_v39 }
 0xb45   :  { %v1935_v51 = vsel %vm332_vm3, %v1931_v50, -inf }
 0xb46   :  { %1936 = vmax.xlane.f32.xlu0 %v1935_v51  ;;  %v1932_v55 = vsel %vm332_vm3, %v1930_v52, -inf }
 0xb48   :  { %v3403_v53 = vpop.f32.mrb[16].mxu1 }
 0xb49   :  { %v2294_v54 = vpop.f32.mrb[17].mxu1  ;;  %v2304_v27 = vmul.f32 0.35355338, %v3403_v53 }
 0xb4a   :  { %v2303_v56 = vmul.f32 0.35355338, %v2294_v54  ;;  %1933 = vmax.xlane.f32.xlu0 %v1932_v55 }
 0xb4b   :  { %v2306_v32 = vadd.f32 %v2304_v27, %v4332_v0 }
 0xb4c   :  { %v4350_v57 = vadd.f32 %v2303_v56, %v4334_v39 }
 0xb4d   :  { %v2310_v40 = vsel %vm332_vm3, %v2306_v32, -inf }
 0xb4e   :  { %v2307_v58 = vsel %vm332_vm3, %v4350_v57, -inf }
 0xb4f   :  { %2308 = vmax.xlane.f32.xlu1 %v2307_v58 }
 0xb5c   :  { %v1732_v59 = vpop.xlane.xlu1 %1731 }
 0xb5d   :  { %v1729_v61 = vpop.xlane.xlu0 %1728  ;;  %v1734_v8 = vsub.f32 %v1726_v42, %v1732_v59 }
 0xb5e   :  { %v1733_v41 = vsub.f32 %v1725_v43, %v1729_v61 }
 0xb60   :  { %v1735_v62 = vmul.f32 1.442695, %v1733_v41  ;;  %v3692_v2 = vpop.permute.xlu1 %3691  ;;  %3686 = vrot.lane.b32.xlu0 %v4297_v11, %s3926_s1  ;;  %2043 = vrot.lane.b32.xlu1 %v4264_v34, %s3934_s27  ;;  %v1737_v34 = vmul.f32 1.442695, %v1734_v8 }
 0xb61   :  { %v3694_v19 = vunpack.i.h.bf16 %v3692_v2  ;;  %v3693_v21 = vunpack.i.l.bf16 %v3692_v2 }
 0xb62   :  { %3750 = vpow2.f32 %v1735_v62 }
 0xb63   :  { %3752 = vpow2.f32 %v1737_v34  ;;  %v3545_v30 = vpack.c.bf16 %v3694_v19, %v3693_v21 }
 0xb64   :  { %v3697_v3 = vpop.permute.xlu1 %3696  ;;  %2506 = vrot.lane.b32.xlu0 %v4300_v13, %s3932_s23 }
 0xb65   :  { %v3699_v4 = vunpack.i.h.bf16 %v3697_v3  ;;  %v3698_v5 = vunpack.i.l.bf16 %v3697_v3 }
 0xb67   :  { %v3559_v6 = vpack.c.bf16 %v3699_v4, %v3698_v5 }
 0xb68   :  { %v2505_v7 = vpop.permute.xlu1 %2504 }
 0xb69   :  { %3561 = vmatprep.subr.msk.bf16.mxu1 %vm4141_vm2, %v3559_v6  ;;  %3420 = vmatprep.mubr.msk.f32.mxu1 %vm244_vm1, %v2505_v7 }
 0xb6a   :  { %3564 = vmatpush3.bf16.xpose.msk.msra.mxu1 %vm4141_vm2, %v3559_v6 }
 0xb6c   :  { %v3751_v18 = vpop.eup %3750 }
 0xb6d   :  { %3370 = vmatprep.mubr.msk.f32.mxu0 %vm332_vm3, %v3751_v18  ;;  %v3753_v36 = vpop.eup %3752  ;;  %v1739_v14 = vsel %vm332_vm3, %v3751_v18, 0.0 }
 0xb6e   :  { %v1742_v9 = vsel %vm332_vm3, %v3753_v36, 0.0 }
 0xb83   :  { %1743 = vadd.xlane.f32.xlu0 %v1742_v9 }
 0xb87   :  { %1740 = vadd.xlane.f32.xlu0 %v1739_v14 }
 0xbd3   :  { %v1937_v10 = vpop.xlane.xlu0 %1936 }
 0xbd4   :  { %v1939_v12 = vsub.f32 %v1931_v50, %v1937_v10 }
 0xbd6   :  { %v1942_v13 = vmul.f32 1.442695, %v1939_v12 }
 0xbd7   :  { %v1934_v15 = vpop.xlane.xlu0 %1933 }
 0xbd8   :  { %3754 = vpow2.f32 %v1942_v13  ;;  %v1938_v48 = vsub.f32 %v1930_v52, %v1934_v15 }
 0xbda   :  { %v1940_v17 = vmul.f32 1.442695, %v1938_v48 }
 0xbdb   :  { %v3687_v20 = vpop.permute.xlu0 %3686 }
 0xbdc   :  { %3756 = vpow2.f32 %v1940_v17  ;;  %v3689_v16 = vunpack.i.h.bf16 %v3687_v20  ;;  %v3688_v25 = vunpack.i.l.bf16 %v3687_v20  ;;  %v2309_v28 = vpop.xlane.xlu1 %2308 }
 0xbdd   :  { %v2313_v47 = vsub.f32 %v4350_v57, %v2309_v28 }
 0xbde   :  { %v3535_v26 = vpack.c.bf16 %v3689_v16, %v3688_v25 }
 0xbdf   :  { %v2507_v29 = vpop.permute.xlu0 %2506  ;;  %v2315_v50 = vmul.f32 1.442695, %v2313_v47 }
 0xbe0   :  { %3536 = vmatprep.subr.bf16.mxu0 %v3535_v26  ;;  %3421 = vmatmul.mubr.msk.f32.vlgmr.msra.gmra.mrb[18].mxu1 %vm244_vm1, %v2507_v29  ;;  %v2044_v24 = vpop.permute.xlu1 %2043 }
 0xbe1   :  { %3538 = vmatpush3.bf16.msra.mxu0 %v3535_v26 }
 0xbe2   :  { %v3755_v1 = vpop.eup %3754  ;;  %3546 = vmatprep.subr.bf16.mxu0 %v3545_v30 }
 0xbe3   :  { %v1947_v31 = vsel %vm332_vm3, %v3755_v1, 0.0 }
 0xbe4   :  { %1948 = vadd.xlane.f32.xlu0 %v1947_v31  ;;  %3371 = vmatmul.mubr.msk.f32.vlgmr.msra.gmra.mrb[12].mxu0 %vm332_vm3, %v3753_v36 }
 0xbe5   :  { %3548 = vmatpush3.bf16.msra.mxu0 %v3545_v30 }
 0xbe6   :  { %v3757_v35 = vpop.eup %3756  ;;  %3387 = vmatprep.subr.mxu0 %v2044_v24 }
 0xbe7   :  { %3384 = vmatprep.mubr.msk.f32.mxu0 %vm332_vm3, %v3757_v35  ;;  %v1944_v42 = vsel %vm332_vm3, %v3757_v35, 0.0 }
 0xbe8   :  { %2311 = vmax.xlane.f32.xlu0 %v2310_v40  ;;  %1945 = vadd.xlane.f32.xlu1 %v1944_v42 }
 0xbe9   :  { %3385 = vmatmul.mubr.msk.f32.vlgmr.msra.gmra.mrb[14].mxu0 %vm332_vm3, %v3755_v1 }
 0xbea   :  { %3388 = vmatpush3.msra.mxu0 %v2044_v24 }
 0xbf9   :  { %3701 = vrot.lane.b32.xlu1 %v4297_v11, %s3928_s19 }
 0xbfe   :  { %2128 = vrot.lane.b32.xlu0 %v4259_v33, %s3934_s27 }
 0xc10   :  { %v1744_v43 = vpop.xlane.xlu0 %1743 }
 0xc11   :  { %3758 = vrcp.f32 %v1744_v43 }
 0xc12   :  { %3760 = vpow2.f32 %v2315_v50 }
 0xc14   :  { %v1741_v63 = vpop.xlane.xlu0 %1740 }
 0xc1b   :  { %v3759_v58 = vpop.eup %3758 }
 0xc1c   :  { %v3761_v2 = vpop.eup %3760 }
 0xc1d   :  { %v2319_v18 = vsel %vm332_vm3, %v3761_v2, 0.0 }
 0xc71   :  { %v1949_v60 = vpop.xlane.xlu0 %1948 }
 0xc75   :  { %v2312_v45 = vpop.xlane.xlu0 %2311  ;;  %v1946_v52 = vpop.xlane.xlu1 %1945 }
 0xc76   :  { %v2314_v49 = vsub.f32 %v2306_v32, %v2312_v45 }
 0xc78   :  { %v2317_v51 = vmul.f32 1.442695, %v2314_v49 }
 0xc79   :  { %v2129_v46 = vpop.permute.xlu0 %2128  ;;  %v3702_v5 = vpop.permute.xlu1 %3701 }
 0xc7a   :  { %3392 = vmatprep.subr.mxu0 %v2129_v46  ;;  %3762 = vpow2.f32 %v2317_v51  ;;  %v3704_v8 = vunpack.i.h.bf16 %v3702_v5  ;;  %v3703_v34 = vunpack.i.l.bf16 %v3702_v5 }
 0xc7b   :  { %3764 = vrcp.f32 %v1949_v60 }
 0xc7c   :  { %3766 = vrcp.f32 %v1946_v52  ;;  %v3555_v13 = vpack.c.bf16 %v3704_v8, %v3703_v34  ;;  %v2838_v8 = vld [vmem:[%s4490_s6 + $0x18] sm:$0xff] }
 0xc7d   :  { %3768 = vrcp.f32 %v1741_v63 }
 0xc84   :  { %v3763_v4 = vpop.eup %3762 }
 0xc85   :  { %v3765_v6 = vpop.eup %3764  ;;  %v2322_v9 = vsel %vm332_vm3, %v3763_v4, 0.0 }
 0xcb3   :  { %v3422_v53 = vpop.f32.mrb[18].mxu1 }
 0xcb4   :  { %v2596_v54 = vmul.f32 0.35355338, %v3422_v53  ;;  %v2586_v33 = vpop.f32.mrb[19].mxu1 }
 0xcb5   :  { %v2595_v55 = vmul.f32 0.35355338, %v2586_v33 }
 0xcb6   :  { %v2598_v56 = vadd.f32 %v2596_v54, %v4332_v0  ;;  %v3767_v0 = vpop.eup %3766 }
 0xcb7   :  { %v3372_v59 = vpop.f32.mrb[12].mxu0  ;;  %v2597_v57 = vadd.f32 %v2595_v55, %v4334_v39  ;;  %v3769_v10 = vpop.eup %3768 }
 0xcb8   :  { %v1835_v61 = vmul.f32 %v3759_v58, %v3372_v59  ;;  %v1825_v41 = vpop.f32.mrb[13].mxu0  ;;  %v2602_v62 = vsel %vm332_vm3, %v2598_v56, -inf }
 0xcb9   :  { %2603 = vmax.xlane.f32.xlu1 %v2602_v62  ;;  %v2599_v3 = vsel %vm332_vm3, %v2597_v57, -inf  ;;  %v1834_v12 = vmul.f32 %v3769_v10, %v1825_v41  ;;  %v2932_v10 = vld [vmem:[%s4491_s7 + $0x18] sm:$0xff] }
 0xcba   :  { %2600 = vmax.xlane.f32.xlu0 %v2599_v3 }
 0xcbc   :  { %v3386_v7 = vpop.f32.mrb[14].mxu0 }
 0xcbd   :  { %v2040_v36 = vmul.f32 %v3765_v6, %v3386_v7  ;;  %v2030_v39 = vpop.f32.mrb[15].mxu0  ;;  %2320 = vadd.xlane.f32.xlu1 %v2319_v18  ;;  %v2835_v6 = vld [vmem:[%s4490_s6] sm:$0xff]  ;;  %v2836_v7 = vld [vmem:[%s4490_s6 + $0x8] sm:$0xff]  ;;  %v2837_v18 = vld [vmem:[%s4490_s6 + $0x10] sm:$0xff] }
 0xcbe   :  { %v2039_v14 = vmul.f32 %v3767_v0, %v2030_v39  ;;  %2323 = vadd.xlane.f32.xlu0 %v2322_v9  ;;  %v3569_v0 = vpack.c.bf16 %v2836_v7, %v2835_v6  ;;  %v3573_v34 = vpack.c.bf16 %v2838_v8, %v2837_v18  ;;  %v2930_v39 = vld [vmem:[%s4491_s7 + $0x8] sm:$0xff]  ;;  %v2931_v9 = vld [vmem:[%s4491_s7 + $0x10] sm:$0xff] }
 0xcc0   :  { %3389 = vmatprep.mubr.msk.f32.mxu0 %vm244_vm1, %v2039_v14  ;;  %3570 = vmatprep.subr.bf16.mxu1 %v3569_v0 }
 0xcc1   :  { %3390 = vmatmul.mubr.msk.f32.vlgmr.msra.gmra.mrb[16].mxu0 %vm244_vm1, %v2040_v36  ;;  %3572 = vmatpush3.bf16.msra.mxu1 %v3569_v0  ;;  %v2929_v36 = vld [vmem:[%s4491_s7] sm:$0xff] }
 0xcc2   :  { %3393 = vmatpush3.msra.mxu0 %v2129_v46  ;;  %3394 = vmatprep.mubr.msk.f32.mxu0 %vm244_vm1, %v1834_v12  ;;  %v3577_v14 = vpack.c.bf16 %v2930_v39, %v2929_v36  ;;  %v3581_v12 = vpack.c.bf16 %v2932_v10, %v2931_v9 }
 0xcc3   :  { %3556 = vmatprep.subr.bf16.mxu0 %v3555_v13  ;;  %3574 = vmatprep.subr.bf16.mxu1 %v3573_v34 }
 0xcc5   :  { %3576 = vmatpush3.bf16.msra.mxu1 %v3573_v34 }
 0xcc9   :  { %3395 = vmatmul.mubr.msk.f32.vlgmr.msra.gmra.mrb[16].mxu0 %vm244_vm1, %v1835_v61 }
 0xcca   :  { %3558 = vmatpush3.bf16.msra.mxu0 %v3555_v13  ;;  %3408 = vmatprep.mubr.msk.f32.mxu0 %vm332_vm3, %v3761_v2  ;;  %v2933_v13 = vld [vmem:[%s4491_s7 + $0x20] sm:$0xff] }
 0xccd   :  { %3409 = vmatmul.mubr.msk.f32.vlgmr.msra.gmra.mrb[18].mxu0 %vm332_vm3, %v3763_v4 }
 0xcce   :  { %3706 = vrot.lane.b32.xlu1 %v4297_v11, %s3931_s20 }
 0xcd4   :  { %2418 = vrot.lane.b32.xlu0 %v4271_v37, %s3934_s27 }
 0xd46   :  { %v2604_v15 = vpop.xlane.xlu1 %2603 }
 0xd47   :  { %v2606_v48 = vsub.f32 %v2598_v56, %v2604_v15  ;;  %v2601_v17 = vpop.xlane.xlu0 %2600  ;;  %v2934_v15 = vld [vmem:[%s4491_s7 + $0x28] sm:$0xff] }
 0xd48   :  { %v2605_v19 = vsub.f32 %v2597_v57, %v2601_v17 }
 0xd49   :  { %v2609_v20 = vmul.f32 1.442695, %v2606_v48  ;;  %v3585_v48 = vpack.c.bf16 %v2934_v15, %v2933_v13 }
 0xd4a   :  { %v2607_v21 = vmul.f32 1.442695, %v2605_v19  ;;  %v2321_v16 = vpop.xlane.xlu1 %2320 }
 0xd4b   :  { %3770 = vpow2.f32 %v2609_v20  ;;  %v2324_v25 = vpop.xlane.xlu0 %2323 }
 0xd4c   :  { %3772 = vpow2.f32 %v2607_v21 }
 0xd4d   :  { %3774 = vrcp.f32 %v2324_v25 }
 0xd4e   :  { %v3707_v26 = vpop.permute.xlu1 %3706  ;;  %3776 = vrcp.f32 %v2321_v16 }
 0xd4f   :  { %v3709_v27 = vunpack.i.h.bf16 %v3707_v26  ;;  %v3708_v28 = vunpack.i.l.bf16 %v3707_v26  ;;  %v2419_v29 = vpop.permute.xlu0 %2418  ;;  %v2823_v26 = vstv %s3121_s12 }
 0xd50   :  { %3411 = vmatprep.subr.mxu0 %v2419_v29 }
 0xd51   :  { %v3565_v30 = vpack.c.bf16 %v3709_v27, %v3708_v28  ;;  %3412 = vmatpush3.msra.mxu0 %v2419_v29 }
 0xd53   :  { %3566 = vmatprep.subr.bf16.mxu0 %v3565_v30 }
 0xd55   :  { %v3771_v11 = vpop.eup %3770 }
 0xd56   :  { %v3773_v37 = vpop.eup %3772  ;;  %v2614_v1 = vsel %vm332_vm3, %v3771_v11, 0.0 }
 0xd57   :  { %2615 = vadd.xlane.f32.xlu0 %v2614_v1  ;;  %v2611_v31 = vsel %vm332_vm3, %v3773_v37, 0.0  ;;  %v3775_v32 = vpop.eup %3774 }
 0xd58   :  { %2612 = vadd.xlane.f32.xlu1 %v2611_v31  ;;  %v3777_v35 = vpop.eup %3776 }
 0xd69   :  { %2794 = vrot.lane.b32.xlu1 %v4290_v44, %s3934_s27 }
 0xd6d   :  { %2708 = vrot.lane.b32.xlu0 %v4276_v38, %s3934_s27 }
 0xda0   :  { %v3410_v24 = vpop.f32.mrb[18].mxu0 }
 0xda1   :  { %v2415_v40 = vmul.f32 %v3775_v32, %v3410_v24  ;;  %v2405_v42 = vpop.f32.mrb[19].mxu0  ;;  %v3123_v24 = vld [vmem:[%s4492_s8 + $0x2] ss:$0 sm:$0xff]  ;;  %s3937_s8 = smov [#allocation12]  }
 0xda2   :  { %v2414_v43 = vmul.f32 %v3777_v35, %v2405_v42  ;;  %v2935_v35 = vld [vmem:[%s4491_s7 + $0x30] sm:$0xff] }
 0xda4   :  { %3413 = vmatprep.mubr.msk.f32.mxu0 %vm244_vm1, %v2414_v43 }
 0xda5   :  { %3414 = vmatmul.mubr.msk.f32.vlgmr.msra.gmra.mrb[16].mxu0 %vm244_vm1, %v2415_v40  ;;  %v2936_v40 = vld [vmem:[%s4491_s7 + $0x38] sm:$0xff]  ;;  %s3031_s7 = sshll.u32 %s3937_s8, 4  ;;  %s3032_s7 = int_to_ptr.vmem [resolvable:$true] %s3031_s7 }
 0xda6   :  { %3568 = vmatpush3.bf16.msra.mxu0 %v3565_v30  ;;  %3427 = vmatprep.mubr.msk.f32.mxu0 %vm332_vm3, %v3773_v37  ;;  %v2832_v37 = vstv %s3122_s5  ;;  %v3589_v42 = vpack.c.bf16 %v2936_v40, %v2935_v35  ;;  %p3891_p10 = scmp.lt.s32.totalorder %s3032_s7, %s3032_s7 }
 0xda9   :  { %3428 = vmatmul.mubr.msk.f32.vlgmr.msra.gmra.mrb[20].mxu0 %vm332_vm3, %v3771_v11 }
 0xde4   :  { %v2616_v44 = vpop.xlane.xlu0 %2615 }
 0xde5   :  { %v2613_v38 = vpop.xlane.xlu1 %2612  ;;  %3778 = vrcp.f32 %v2616_v44 }
 0xde6   :  { %3780 = vrcp.f32 %v2613_v38 }
 0xde8   :  { %v2709_v63 = vpop.permute.xlu0 %2708 }
 0xde9   :  { %3430 = vmatprep.subr.mxu0 %v2709_v63  ;;  %v2795_v51 = vpop.permute.xlu1 %2794 }
 0xdea   :  { %3431 = vmatpush3.msra.mxu0 %v2709_v63 }
 0xdeb   :  { %3578 = vmatprep.subr.bf16.mxu0 %v3577_v14 }
 0xdef   :  { %v3779_v60 = vpop.eup %3778 }
 0xdf0   :  { %v3781_v46 = vpop.eup %3780 }
 0xe7c   :  { %v3429_v45 = vpop.f32.mrb[20].mxu0 }
 0xe7d   :  { %v2707_v47 = vmul.f32 %v3779_v60, %v3429_v45  ;;  %v2697_v49 = vpop.f32.mrb[21].mxu0 }
 0xe7e   :  { %v2706_v50 = vmul.f32 %v3781_v46, %v2697_v49 }
 0xe80   :  { %3432 = vmatprep.mubr.msk.f32.mxu0 %vm244_vm1, %v2706_v50 }
 0xe81   :  { %3433 = vmatmul.mubr.msk.f32.vlgmr.msra.gmra.mrb[16].mxu0 %vm244_vm1, %v2707_v47 }
 0xe82   :  { %3580 = vmatpush3.bf16.msra.mxu0 %v3577_v14 }
 0xe83   :  { %3582 = vmatprep.subr.bf16.mxu0 %v3581_v12 }
 0xe86   :  { %3584 = vmatpush3.bf16.msra.mxu0 %v3581_v12 }
 0xe87   :  { %3586 = vmatprep.subr.bf16.mxu0 %v3585_v48 }
 0xe8a   :  { %3588 = vmatpush3.bf16.msra.mxu0 %v3585_v48 }
 0xe8b   :  { %3590 = vmatprep.subr.bf16.mxu0 %v3589_v42 }
 0xe8e   :  { %3592 = vmatpush3.bf16.msra.mxu0 %v3589_v42 }
 0xf54   :  { %v3434_v52 = vpop.f32.mrb[16].mxu0 }
 0xf55   :  { %v2798_v53 = vadd.f32 %v3434_v52, %v2795_v51  ;;  %v2783_v54 = vpop.f32.mrb[17].mxu0 }
 0xf56   :  { %v2797_v33 = vadd.f32 %v2795_v51, %v2783_v54 }
 0xf57   :  { %v4410_v55 = vadd.f32 %v2798_v53, %v4243_v22 }
 0xf58   :  { %v4413_v56 = vadd.f32 %v2797_v33, %v4246_v23 }
 0xf59   :  { %v2806_v58 = vsel %vm110_vm0, %v4410_v55, 0.0 }
 0xf5a   :  { %2807 = vadd.xlane.f32.xlu0 %v2806_v58  ;;  %v2803_v59 = vsel %vm110_vm0, %v4413_v56, 0.0 }
 0xf5b   :  { %2804 = vadd.xlane.f32.xlu1 %v2803_v59 }
 0xfe7   :  { %v2808_v57 = vpop.xlane.xlu0 %2807 }
 0xfe8   :  { %v2810_v61 = vmul.f32 0.03125, %v2808_v57  ;;  %v2805_v41 = vpop.xlane.xlu1 %2804 }
 0xfe9   :  { %v2809_v62 = vmul.f32 0.03125, %v2805_v41 }
 0xfea   :  { %v2812_v2 = vsub.f32 %v4410_v55, %v2810_v61 }
 0xfeb   :  { %v2811_v22 = vsub.f32 %v4413_v56, %v2809_v62 }
 0xfec   :  { %v2814_v3 = vmul.f32 %v2812_v2, %v2812_v2  ;;  %v2825_v27 = vmul.f32 %v2823_v26, %v2812_v2 }
 0xfed   :  { %v2813_v4 = vmul.f32 %v2811_v22, %v2811_v22  ;;  %v2824_v29 = vmul.f32 %v2823_v26, %v2811_v22 }
 0xfee   :  { %v2818_v23 = vsel %vm110_vm0, %v2814_v3, 0.0 }
 0xfef   :  { %2819 = vadd.xlane.f32.xlu1 %v2818_v23  ;;  %v2815_v5 = vsel %vm110_vm0, %v2813_v4, 0.0 }
 0xff0   :  { %2816 = vadd.xlane.f32.xlu0 %v2815_v5 }
0x1006   :  { %2937 = vrot.lane.b32.xlu0 %v3123_v24, %s3930_s2  ;;  %s3886_s2 = scalar_lea.vmem %s3032_s7, 256 }
0x1007   :  { %p3887_p9 = scmp.ne.s32.totalorder %s3032_s7, %s3886_s2  ;;  %p3892_p11 = scmp.lt.s32.totalorder %s3886_s2, %s3886_s2 }
0x1009   :  { %p3893_p12 = por %p3892_p11, %p3891_p10 }
0x100b   :  { %p3894_p13 = pnand %p3893_p12, %p3887_p9 }
0x107c   :  { %v2820_v17 = vpop.xlane.xlu1 %2819 }
0x107d   :  { %v2822_v19 = vmul.f32 0.032258064, %v2820_v17  ;;  %v2817_v20 = vpop.xlane.xlu0 %2816 }
0x107e   :  { %v2821_v21 = vmul.f32 0.032258064, %v2817_v20 }
0x107f   :  { %v2827_v16 = vadd.f32 1e-06, %v2822_v19 }
0x1080   :  { %v2826_v25 = vadd.f32 1e-06, %v2821_v21 }
0x1081   :  { %3782 = vrsqrt.f32 %v2827_v16  ;;  %v2938_v46 = vpop.permute.xlu0 %2937 }
0x1082   :  { %3784 = vrsqrt.f32 %v2826_v25 }
0x108b   :  { %v3783_v28 = vpop.eup %3782 }
0x108c   :  { %v3785_v30 = vpop.eup %3784  ;;  %v2831_v11 = vmul.f32 %v3783_v28, %v2825_v27 }
0x108d   :  { %v2830_v1 = vmul.f32 %v3785_v30, %v2824_v29 }
0x108e   :  { %v2834_v32 = vadd.f32 %v2832_v37, %v2831_v11 }
0x108f   :  { %v2833_v31 = vadd.f32 %v2832_v37, %v2830_v1 }
0x1091   :  { %3443 = vmatprep.mubr.msk.f32.mxu1 %vm110_vm0, %v2833_v31 }
0x1092   :  { %3444 = vmatmul.mubr.msk.f32.vlgmr.msra.gmra.mrb[20].mxu1 %vm110_vm0, %v2834_v32 }
0x1165   :  { %v3445_v43 = vpop.f32.mrb[20].mxu1 }
0x1166   :  { %v2924_v44 = vadd.f32 %v3445_v43, %v3123_v24  ;;  %v2918_v63 = vpop.f32.mrb[21].mxu1 }
0x1167   :  { %v2919_v38 = vadd.f32 %v3123_v24, %v2918_v63 }
0x1168   :  { %v2928_v45 = vmax.f32 %v2924_v44, 0.0 }
0x1169   :  { %v2927_v60 = vmax.f32 %v2919_v38, 0.0 }
0x116b   :  { %3462 = vmatprep.mubr.msk.f32.mxu0 %vm2940_vm4, %v2927_v60 }
0x116c   :  { %3463 = vmatmul.mubr.msk.f32.vlgmr.msra.gmra.mrb[22].mxu0 %vm2940_vm4, %v2928_v45 }
0x123f   :  { %v3464_v47 = vpop.f32.mrb[22].mxu0 }
0x1240   :  { %v3019_v49 = vadd.f32 %v3464_v47, %v2938_v46  ;;  %v3013_v50 = vpop.f32.mrb[23].mxu0 }
0x1241   :  { %v3014_v51 = vadd.f32 %v3013_v50, %v2938_v46 }
0x1242   :  { %v3023_v52 = vadd.f32 %v3019_v49, %v4410_v55 }
0x1243   :  { %v3022_v53 = vadd.f32 %v3014_v51, %v4413_v56 }
0x1244   :  { %3025 = vst.msk [vmem:[#allocation12 + $0x8] sm:$0xff] %vm110_vm0, %v3023_v52 }
0x1245   :  { %3024 = vst.msk [vmem:[#allocation12] sm:$0xff] %vm110_vm0, %v3022_v53 }
0x1246   :  { %3897 = shalt.err (!%p3894_p13)
}
0x1247   :  { %s3898_s21 = scalar_lea.hbm %s4494_s10, 256 }
0x1248   :  { %p3899_p0 = scmp.ne.s32.totalorder %s4494_s10, %s3898_s21  ;;  %p3902_p1 = scmp.lt.u32.totalorder %s3898_s21, %s4494_s10 }
0x124a   :  { %p3904_p2 = pnand %p3902_p1, %p3899_p0 }
0x124c   :  { %3907 = shalt.err (!%p3904_p2)
}
0x124d   :  { %3037 = dma.vmem_to_hbm [thread:$0]  %s3032_s7, 256, %s4494_s10, [#allocation4], %s3920_s25, %s3920_s25, %s3921_s26  }
0x124e   :  { %3916 = dma.done.wait [#allocation4], 256  }
0x124f   :  { %3917 = vsyncadd [#allocation4], 4294967040 }
0x1250   :  { %3041 = vsyncpa [#allocation3], 1 }
0x1251   :  { %3042 = vsyncpa [#allocation7], 1 }
0x1252   :  { %3043 = vsyncpa [#allocation10], 1 }
0x1253   :  { %3044 = vsyncpa [#allocation4], 1 }
0x1254   :  { %3045 = vsyncpa [#allocation5], 1 }

</bundles_post_ra>
